<compile_context>
chip_gen: v7x
topology: tpu7x:2x2x1
jax: 0.10.0
libtpu: 0.0.40
codegen_flags: <defaults>
</compile_context>

<pallas_src>
import functools

import jax
import jax.numpy as jnp
from jax.experimental import pallas as pl
from jax.experimental.pallas import tpu as pltpu

NEG_SLOPE = 0.2  # DGL GATConv default negative_slope


# ----------------------------------------------------------------------------
# Fused kernel: layer1 -> layer2 -> head mean -> node stack, single invocation.
#   feat_ref : (B, N, Din)
#   adj_ref  : (N, N)        adj[v, u] = 1.0 if edge u -> v (v aggregates u)
#   w1_ref   : (Din, H*h_dim)        layer-1 fc weight
#   p1_ref   : (H*h_dim, 2H)         packed block-diag [attn_l1 | attn_r1]
#   b1_ref   : (1, H*h_dim)          layer-1 bias
#   w2_ref   : (H*h_dim, H*out_dim)  layer-2 fc weight
#   p2_ref   : (H*out_dim, 2H)       packed block-diag [attn_l2 | attn_r2]
#   b2_ref   : (1, H*out_dim)        layer-2 bias
#   o_ref    : (5, B, out_dim)
# ----------------------------------------------------------------------------
def _gat_fused_kernel(feat_ref, adj_ref, w1_ref, p1_ref, b1_ref,
                      w2_ref, p2_ref, b2_ref, o_ref,
                      *, B, N, H, h_dim, out_dim):
    # Hoisted adjacency mask: additive bias computed once, reused by all heads/layers.
    adj = adj_ref[...]                                                    # (N, N)
    mask_bias = jnp.where(adj > 0, jnp.float32(0.0), jnp.float32(-1e30))  # (N, N)

    def gat_layer(z2d, p_attn, bias_row, d):
        """One GATConv given pre-projected features z2d = fc(x).

        z2d      : (B*N, H*d)  heads concatenated on the lane axis
        p_attn   : (H*d, 2H)   block-diag [attn_l | attn_r]
        bias_row : (1, H*d)    output bias
        returns  : list of H per-head outputs, each (B, N, d)
        """
        # Scores for all heads with one MXU matmul:
        #   scores[:, h] = el_h (source score), scores[:, H+h] = er_h (dest score).
        scores = jnp.dot(z2d, p_attn, preferred_element_type=jnp.float32)  # (B*N, 2H)
        scores = scores.reshape(B, N, 2 * H)                               # (B, N, 2H)
        # One small batched transpose per layer: source scores onto the lane axis.
        scores_t = jnp.transpose(scores, (0, 2, 1))                        # (B, 2H, N)
        z3 = z2d.reshape(B, N, H * d)                                      # (B, N, H*d)

        outs = []
        for h in range(H):                                                 # H small, unrolled
            lo = h * d
            zh = z3[:, :, lo:lo + d]                                       # (B, N, d)
            er = scores[:, :, H + h:H + h + 1]                             # (B, Ndst, 1)
            el = scores_t[:, h:h + 1, :]                                   # (B, 1, Nsrc)
            # e[b, v, u] = LeakyReLU(el[b, u] + er[b, v]), masked softmax over u.
            e = er + el                                                    # (B, N, N)
            e = jnp.where(e > 0, e, NEG_SLOPE * e)
            e = e + mask_bias[None]
            m = jnp.max(e, axis=-1, keepdims=True)
            p = jnp.exp(e - m)                        # masked entries underflow to 0
            alpha = p / jnp.sum(p, axis=-1, keepdims=True)                 # (B, N, N)
            agg = jnp.einsum('bvu,buc->bvc', alpha, zh,
                             preferred_element_type=jnp.float32)           # (B, N, d)
            outs.append(agg + bias_row[:, lo:lo + d][None])
        return outs

    # ------------------------------ layer 1 ----------------------------------
    x2d = feat_ref[...].reshape(B * N, -1)                                 # (B*N, Din)
    z1 = jnp.dot(x2d, w1_ref[...], preferred_element_type=jnp.float32)     # (B*N, H*h_dim)
    outs1 = gat_layer(z1, p1_ref[...], b1_ref[...], h_dim)                 # H x (B, N, h_dim)

    # ------------------------------ layer 2 ----------------------------------
    # fc of the head-concatenated layer-1 output WITHOUT materializing the concat:
    #   z2 = sum_h out1_h @ w2[h*h_dim:(h+1)*h_dim, :]
    w2 = w2_ref[...]                                                       # (H*h_dim, H*out_dim)
    z2 = jnp.zeros((B * N, H * out_dim), jnp.float32)
    for h in range(H):
        z2 = z2 + jnp.dot(outs1[h].reshape(B * N, h_dim),
                          w2[h * h_dim:(h + 1) * h_dim, :],
                          preferred_element_type=jnp.float32)
    outs2 = gat_layer(z2, p2_ref[...], b2_ref[...], out_dim)               # H x (B, N, out)

    # Head mean (torch mean over the head axis) without a concat.
    xm = outs2[0]
    for h in range(1, H):
        xm = xm + outs2[h]
    xm = xm * jnp.float32(1.0 / H)                                         # (B, N, out)

    # ----------------- node-aggregation epilogue (fused, direct stores) ------
    # torch: stack((x[0], x[1], max(x[2:]), min(x[2:]), mean(x[2:])), dim=0)
    rest = xm[:, 2:, :]                                                    # (B, N-2, out)
    o_ref[0] = xm[:, 0, :]
    o_ref[1] = xm[:, 1, :]
    o_ref[2] = jnp.max(rest, axis=1)
    o_ref[3] = jnp.min(rest, axis=1)
    o_ref[4] = jnp.sum(rest, axis=1) * jnp.float32(1.0 / (N - 2))


def _pack_attn(attn_l, attn_r, num_heads, d):
    """(H, d) attn_l / attn_r -> (H*d, 2H) block-diagonal projection so that
    z @ P yields [el_0..el_{H-1}, er_0..er_{H-1}] with a single matmul."""
    eye = jnp.eye(num_heads, dtype=jnp.float32)
    al = (attn_l[:, :, None] * eye[:, None, :]).reshape(num_heads * d, num_heads)
    ar = (attn_r[:, :, None] * eye[:, None, :]).reshape(num_heads * d, num_heads)
    return jnp.concatenate([al, ar], axis=1)


def gat_forward(feat, adj, params, num_heads, h_dim, out_dim):
    """feat: (B, N, input_dim), adj: (N, N) with adj[v, u]=1 for edge u -> v.
    Returns (5, B, out_dim), matching the PyTorch module's output layout."""
    B, N, _ = feat.shape
    H = num_heads
    p1 = _pack_attn(params["al1"], params["ar1"], H, h_dim)
    p2 = _pack_attn(params["al2"], params["ar2"], H, out_dim)
    b1 = params["b1"].reshape(1, H * h_dim)
    b2 = params["b2"].reshape(1, H * out_dim)

    kernel = functools.partial(_gat_fused_kernel, B=B, N=N, H=H,
                               h_dim=h_dim, out_dim=out_dim)
    vmem = pl.BlockSpec(memory_space=pltpu.MemorySpace.VMEM)
    # Whole problem (<1 MiB) is VMEM-resident on every TPU generation; one launch, no grid.
    # TODO(synk): for large N, tile destination rows and stream source blocks with an
    # online (flash-style) edge softmax and int8 adjacency instead of the dense (N, N)
    # attention matrix; feed MXU matmuls in bf16 when scaling on v6e/v7x.
    return pl.pallas_call(
        kernel,
        out_shape=jax.ShapeDtypeStruct((5, B, out_dim), jnp.float32),
        in_specs=[vmem] * 8,
        out_specs=vmem,
    )(feat, adj, params["w1"], p1, b1, params["w2"], p2, b2)


# ----------------------------------------------------------------------------
# Pure-JAX reference (same math, no Pallas) for correctness checking.
# ----------------------------------------------------------------------------
def _gat_conv_ref(x, w, al, ar, b, adj, H, OUT):
    z = jnp.einsum("bnd,de->bne", x, w)
    zr = z.reshape(z.shape[0], z.shape[1], H, OUT)
    el = (zr * al[None, None]).sum(-1)                              # (B, N, H)
    er = (zr * ar[None, None]).sum(-1)
    e = er[:, :, None, :] + el[:, None, :, :]                       # (B, Ndst, Nsrc, H)
    e = jnp.where(e > 0, e, NEG_SLOPE * e)
    mask = adj[None, :, :, None] > 0
    e = jnp.where(mask, e, -1e30)
    p = jnp.exp(e - e.max(axis=2, keepdims=True))
    p = jnp.where(mask, p, 0.0)
    alpha = p / p.sum(axis=2, keepdims=True)
    out = jnp.einsum("bvuh,buhd->bvhd", alpha, zr) + b.reshape(1, 1, H, OUT)
    return out.reshape(z.shape[0], z.shape[1], H * OUT)


def gat_forward_ref(feat, adj, params, num_heads, h_dim, out_dim):
    x = _gat_conv_ref(feat, params["w1"], params["al1"], params["ar1"],
                      params["b1"], adj, num_heads, h_dim)
    x = _gat_conv_ref(x, params["w2"], params["al2"], params["ar2"],
                      params["b2"], adj, num_heads, out_dim)
    B, N, _ = x.shape
    x = x.reshape(B, N, num_heads, out_dim).mean(axis=2)
    rest = x[:, 2:, :]
    return jnp.stack([x[:, 0, :], x[:, 1, :],
                      rest.max(axis=1), rest.min(axis=1),
                      rest.mean(axis=1)], axis=0)


if __name__ == "__main__":
    # Small, deterministic problem consistent with the module's __init__.
    B, N = 2, 8                   # batch of feature vectors per node, num graph nodes (>= 3)
    input_dim, h_dim, out_dim, num_heads = 16, 8, 8, 4

    key = jax.random.PRNGKey(0)
    keys = jax.random.split(key, 10)

    feat = jax.random.normal(keys[0], (B, N, input_dim), dtype=jnp.float32)

    # Deterministic adjacency with self-loops (no zero in-degree nodes).
    adj = (jax.random.uniform(keys[1], (N, N)) < 0.5).astype(jnp.float32)
    adj = jnp.maximum(adj, jnp.eye(N, dtype=jnp.float32))           # adj[v, u]: edge u -> v

    s = 0.1
    params = {
        "w1":  s * jax.random.normal(keys[2], (input_dim, num_heads * h_dim), jnp.float32),
        "al1": s * jax.random.normal(keys[3], (num_heads, h_dim), jnp.float32),
        "ar1": s * jax.random.normal(keys[4], (num_heads, h_dim), jnp.float32),
        "b1":  s * jax.random.normal(keys[5], (num_heads * h_dim,), jnp.float32),
        "w2":  s * jax.random.normal(keys[6], (num_heads * h_dim, num_heads * out_dim), jnp.float32),
        "al2": s * jax.random.normal(keys[7], (num_heads, out_dim), jnp.float32),
        "ar2": s * jax.random.normal(keys[8], (num_heads, out_dim), jnp.float32),
        "b2":  s * jax.random.normal(keys[9], (num_heads * out_dim,), jnp.float32),
    }

    out = gat_forward(feat, adj, params, num_heads, h_dim, out_dim)
    out = jax.block_until_ready(out)

    ref = gat_forward_ref(feat, adj, params, num_heads, h_dim, out_dim)
    assert out.shape == (5, B, out_dim), out.shape
    # Slightly loose tolerance: kernel computes attention scores via an MXU matmul,
    # whose f32 pass/rounding behavior can differ marginally from the XLA reference.
    assert jnp.allclose(out, ref, rtol=1e-3, atol=1e-3), float(jnp.abs(out - ref).max())

    print("KERNEL_OK")
</pallas_src>

<mosaic_0001>
module attributes {stable_mosaic.version = 11 : i64} {
  func.func @_gat_fused_kernel(%arg0: memref<2x8x16xf32, #tpu.memory_space<vmem>>, %arg1: memref<8x8xf32, #tpu.memory_space<vmem>>, %arg2: memref<16x32xf32, #tpu.memory_space<vmem>>, %arg3: memref<32x8xf32, #tpu.memory_space<vmem>>, %arg4: memref<1x32xf32, #tpu.memory_space<vmem>>, %arg5: memref<32x32xf32, #tpu.memory_space<vmem>>, %arg6: memref<32x8xf32, #tpu.memory_space<vmem>>, %arg7: memref<1x32xf32, #tpu.memory_space<vmem>>, %arg8: memref<5x2x8xf32, #tpu.memory_space<vmem>>) attributes {dimension_semantics = [], scalar_prefetch = 0 : i64, scratch_operands = 0 : i64, tpu.core_type = #tpu.core_type<tc>} {
    %c0 = arith.constant 0 : index
    %c0_0 = arith.constant 0 : index
    %0 = vector.load %arg1[%c0, %c0_0] : memref<8x8xf32, #tpu.memory_space<vmem>>, vector<8x8xf32>
    %cst = arith.constant 0.000000e+00 : f32
    %1 = vector.broadcast %cst : f32 to vector<8x8xf32>
    %2 = arith.cmpf ogt, %0, %1 : vector<8x8xf32>
    %cst_1 = arith.constant 0.000000e+00 : f32
    %cst_2 = arith.constant -1.000000e+30 : f32
    %3 = vector.broadcast %cst_1 : f32 to vector<8x8xf32>
    %4 = vector.broadcast %cst_2 : f32 to vector<8x8xf32>
    %5 = arith.select %2, %3, %4 : vector<8x8xi1>, vector<8x8xf32>
    %c0_3 = arith.constant 0 : index
    %c0_4 = arith.constant 0 : index
    %c0_5 = arith.constant 0 : index
    %6 = vector.load %arg0[%c0_3, %c0_4, %c0_5] : memref<2x8x16xf32, #tpu.memory_space<vmem>>, vector<2x8x16xf32>
    %7 = vector.shape_cast %6 : vector<2x8x16xf32> to vector<16x16xf32>
    %c0_6 = arith.constant 0 : index
    %c0_7 = arith.constant 0 : index
    %8 = vector.load %arg2[%c0_6, %c0_7] : memref<16x32xf32, #tpu.memory_space<vmem>>, vector<16x32xf32>
    %cst_8 = arith.constant dense<0.000000e+00> : vector<16x32xf32>
    %9 = tpu.matmul %7, %8, %cst_8 {dimension_numbers = #tpu.dot_dimension_numbers<[1], [0], [0], [1], [0, 0, 1, 1], [], []>} : vector<16x16xf32>, vector<16x32xf32>, vector<16x32xf32> -> vector<16x32xf32>
    %c0_9 = arith.constant 0 : index
    %c0_10 = arith.constant 0 : index
    %10 = vector.load %arg3[%c0_9, %c0_10] : memref<32x8xf32, #tpu.memory_space<vmem>>, vector<32x8xf32>
    %c0_11 = arith.constant 0 : index
    %c0_12 = arith.constant 0 : index
    %11 = vector.load %arg4[%c0_11, %c0_12] : memref<1x32xf32, #tpu.memory_space<vmem>>, vector<1x32xf32>
    %cst_13 = arith.constant dense<0.000000e+00> : vector<16x8xf32>
    %12 = tpu.matmul %9, %10, %cst_13 {dimension_numbers = #tpu.dot_dimension_numbers<[1], [0], [0], [1], [0, 0, 1, 1], [], []>} : vector<16x32xf32>, vector<32x8xf32>, vector<16x8xf32> -> vector<16x8xf32>
    %13 = vector.shape_cast %12 : vector<16x8xf32> to vector<2x8x8xf32>
    %14 = tpu.transpose %13, [0, 2, 1] : vector<2x8x8xf32> -> vector<2x8x8xf32>
    %15 = vector.shape_cast %9 : vector<16x32xf32> to vector<2x8x32xf32>
    %16 = vector.extract_strided_slice %15 {offsets = [0, 0, 0], sizes = [2, 8, 8], strides = [1, 1, 1]} : vector<2x8x32xf32> to vector<2x8x8xf32>
    %17 = vector.extract_strided_slice %13 {offsets = [0, 0, 4], sizes = [2, 8, 1], strides = [1, 1, 1]} : vector<2x8x8xf32> to vector<2x8x1xf32>
    %18 = vector.extract_strided_slice %14 {offsets = [0, 0, 0], sizes = [2, 1, 8], strides = [1, 1, 1]} : vector<2x8x8xf32> to vector<2x1x8xf32>
    %19 = vector.broadcast %17 : vector<2x8x1xf32> to vector<2x8x8xf32>
    %20 = vector.broadcast %18 : vector<2x1x8xf32> to vector<2x8x8xf32>
    %21 = arith.addf %19, %20 : vector<2x8x8xf32>
    %cst_14 = arith.constant 0.000000e+00 : f32
    %22 = vector.broadcast %cst_14 : f32 to vector<2x8x8xf32>
    %23 = arith.cmpf ogt, %21, %22 : vector<2x8x8xf32>
    %cst_15 = arith.constant 2.000000e-01 : f32
    %24 = vector.broadcast %cst_15 : f32 to vector<2x8x8xf32>
    %25 = arith.mulf %24, %21 : vector<2x8x8xf32>
    %26 = arith.select %23, %21, %25 : vector<2x8x8xi1>, vector<2x8x8xf32>
    %27 = vector.shape_cast %5 : vector<8x8xf32> to vector<1x8x8xf32>
    %28 = vector.broadcast %27 : vector<1x8x8xf32> to vector<2x8x8xf32>
    %29 = arith.addf %26, %28 : vector<2x8x8xf32>
    %cst_16 = arith.constant dense<0xFF800000> : vector<2x8xf32>
    %30 = vector.multi_reduction <maximumf>, %29, %cst_16 [2] : vector<2x8x8xf32> to vector<2x8xf32>
    %31 = vector.shape_cast %30 : vector<2x8xf32> to vector<2x8x1xf32>
    %32 = vector.broadcast %31 : vector<2x8x1xf32> to vector<2x8x8xf32>
    %33 = arith.subf %29, %32 : vector<2x8x8xf32>
    %34 = math.exp %33 : vector<2x8x8xf32>
    %cst_17 = arith.constant dense<0.000000e+00> : vector<2x8xf32>
    %35 = vector.multi_reduction <add>, %34, %cst_17 [2] : vector<2x8x8xf32> to vector<2x8xf32>
    %36 = vector.shape_cast %35 : vector<2x8xf32> to vector<2x8x1xf32>
    %37 = vector.broadcast %36 : vector<2x8x1xf32> to vector<2x8x8xf32>
    %38 = arith.divf %34, %37 : vector<2x8x8xf32>
    "tpu.trace_start"() <{level = 10 : i32, message = "bvu,buc->bvc"}> : () -> ()
    %cst_18 = arith.constant dense<0.000000e+00> : vector<2x8x8xf32>
    %39 = tpu.matmul %38, %16, %cst_18 {dimension_numbers = #tpu.dot_dimension_numbers<[2], [1], [1], [2], [0, 0, 0, 1, 1, 2], [0], [0]>} : vector<2x8x8xf32>, vector<2x8x8xf32>, vector<2x8x8xf32> -> vector<2x8x8xf32>
    "tpu.trace_stop"() : () -> ()
    %40 = vector.extract_strided_slice %11 {offsets = [0, 0], sizes = [1, 8], strides = [1, 1]} : vector<1x32xf32> to vector<1x8xf32>
    %41 = vector.shape_cast %40 : vector<1x8xf32> to vector<1x1x8xf32>
    %42 = vector.broadcast %41 : vector<1x1x8xf32> to vector<2x8x8xf32>
    %43 = arith.addf %39, %42 : vector<2x8x8xf32>
    %44 = vector.extract_strided_slice %15 {offsets = [0, 0, 8], sizes = [2, 8, 8], strides = [1, 1, 1]} : vector<2x8x32xf32> to vector<2x8x8xf32>
    %45 = vector.extract_strided_slice %13 {offsets = [0, 0, 5], sizes = [2, 8, 1], strides = [1, 1, 1]} : vector<2x8x8xf32> to vector<2x8x1xf32>
    %46 = vector.extract_strided_slice %14 {offsets = [0, 1, 0], sizes = [2, 1, 8], strides = [1, 1, 1]} : vector<2x8x8xf32> to vector<2x1x8xf32>
    %47 = vector.broadcast %45 : vector<2x8x1xf32> to vector<2x8x8xf32>
    %48 = vector.broadcast %46 : vector<2x1x8xf32> to vector<2x8x8xf32>
    %49 = arith.addf %47, %48 : vector<2x8x8xf32>
    %cst_19 = arith.constant 0.000000e+00 : f32
    %50 = vector.broadcast %cst_19 : f32 to vector<2x8x8xf32>
    %51 = arith.cmpf ogt, %49, %50 : vector<2x8x8xf32>
    %cst_20 = arith.constant 2.000000e-01 : f32
    %52 = vector.broadcast %cst_20 : f32 to vector<2x8x8xf32>
    %53 = arith.mulf %52, %49 : vector<2x8x8xf32>
    %54 = arith.select %51, %49, %53 : vector<2x8x8xi1>, vector<2x8x8xf32>
    %55 = vector.shape_cast %5 : vector<8x8xf32> to vector<1x8x8xf32>
    %56 = vector.broadcast %55 : vector<1x8x8xf32> to vector<2x8x8xf32>
    %57 = arith.addf %54, %56 : vector<2x8x8xf32>
    %cst_21 = arith.constant dense<0xFF800000> : vector<2x8xf32>
    %58 = vector.multi_reduction <maximumf>, %57, %cst_21 [2] : vector<2x8x8xf32> to vector<2x8xf32>
    %59 = vector.shape_cast %58 : vector<2x8xf32> to vector<2x8x1xf32>
    %60 = vector.broadcast %59 : vector<2x8x1xf32> to vector<2x8x8xf32>
    %61 = arith.subf %57, %60 : vector<2x8x8xf32>
    %62 = math.exp %61 : vector<2x8x8xf32>
    %cst_22 = arith.constant dense<0.000000e+00> : vector<2x8xf32>
    %63 = vector.multi_reduction <add>, %62, %cst_22 [2] : vector<2x8x8xf32> to vector<2x8xf32>
    %64 = vector.shape_cast %63 : vector<2x8xf32> to vector<2x8x1xf32>
    %65 = vector.broadcast %64 : vector<2x8x1xf32> to vector<2x8x8xf32>
    %66 = arith.divf %62, %65 : vector<2x8x8xf32>
    "tpu.trace_start"() <{level = 10 : i32, message = "bvu,buc->bvc"}> : () -> ()
    %cst_23 = arith.constant dense<0.000000e+00> : vector<2x8x8xf32>
    %67 = tpu.matmul %66, %44, %cst_23 {dimension_numbers = #tpu.dot_dimension_numbers<[2], [1], [1], [2], [0, 0, 0, 1, 1, 2], [0], [0]>} : vector<2x8x8xf32>, vector<2x8x8xf32>, vector<2x8x8xf32> -> vector<2x8x8xf32>
    "tpu.trace_stop"() : () -> ()
    %68 = vector.extract_strided_slice %11 {offsets = [0, 8], sizes = [1, 8], strides = [1, 1]} : vector<1x32xf32> to vector<1x8xf32>
    %69 = vector.shape_cast %68 : vector<1x8xf32> to vector<1x1x8xf32>
    %70 = vector.broadcast %69 : vector<1x1x8xf32> to vector<2x8x8xf32>
    %71 = arith.addf %67, %70 : vector<2x8x8xf32>
    %72 = vector.extract_strided_slice %15 {offsets = [0, 0, 16], sizes = [2, 8, 8], strides = [1, 1, 1]} : vector<2x8x32xf32> to vector<2x8x8xf32>
    %73 = vector.extract_strided_slice %13 {offsets = [0, 0, 6], sizes = [2, 8, 1], strides = [1, 1, 1]} : vector<2x8x8xf32> to vector<2x8x1xf32>
    %74 = vector.extract_strided_slice %14 {offsets = [0, 2, 0], sizes = [2, 1, 8], strides = [1, 1, 1]} : vector<2x8x8xf32> to vector<2x1x8xf32>
    %75 = vector.broadcast %73 : vector<2x8x1xf32> to vector<2x8x8xf32>
    %76 = vector.broadcast %74 : vector<2x1x8xf32> to vector<2x8x8xf32>
    %77 = arith.addf %75, %76 : vector<2x8x8xf32>
    %cst_24 = arith.constant 0.000000e+00 : f32
    %78 = vector.broadcast %cst_24 : f32 to vector<2x8x8xf32>
    %79 = arith.cmpf ogt, %77, %78 : vector<2x8x8xf32>
    %cst_25 = arith.constant 2.000000e-01 : f32
    %80 = vector.broadcast %cst_25 : f32 to vector<2x8x8xf32>
    %81 = arith.mulf %80, %77 : vector<2x8x8xf32>
    %82 = arith.select %79, %77, %81 : vector<2x8x8xi1>, vector<2x8x8xf32>
    %83 = vector.shape_cast %5 : vector<8x8xf32> to vector<1x8x8xf32>
    %84 = vector.broadcast %83 : vector<1x8x8xf32> to vector<2x8x8xf32>
    %85 = arith.addf %82, %84 : vector<2x8x8xf32>
    %cst_26 = arith.constant dense<0xFF800000> : vector<2x8xf32>
    %86 = vector.multi_reduction <maximumf>, %85, %cst_26 [2] : vector<2x8x8xf32> to vector<2x8xf32>
    %87 = vector.shape_cast %86 : vector<2x8xf32> to vector<2x8x1xf32>
    %88 = vector.broadcast %87 : vector<2x8x1xf32> to vector<2x8x8xf32>
    %89 = arith.subf %85, %88 : vector<2x8x8xf32>
    %90 = math.exp %89 : vector<2x8x8xf32>
    %cst_27 = arith.constant dense<0.000000e+00> : vector<2x8xf32>
    %91 = vector.multi_reduction <add>, %90, %cst_27 [2] : vector<2x8x8xf32> to vector<2x8xf32>
    %92 = vector.shape_cast %91 : vector<2x8xf32> to vector<2x8x1xf32>
    %93 = vector.broadcast %92 : vector<2x8x1xf32> to vector<2x8x8xf32>
    %94 = arith.divf %90, %93 : vector<2x8x8xf32>
    "tpu.trace_start"() <{level = 10 : i32, message = "bvu,buc->bvc"}> : () -> ()
    %cst_28 = arith.constant dense<0.000000e+00> : vector<2x8x8xf32>
    %95 = tpu.matmul %94, %72, %cst_28 {dimension_numbers = #tpu.dot_dimension_numbers<[2], [1], [1], [2], [0, 0, 0, 1, 1, 2], [0], [0]>} : vector<2x8x8xf32>, vector<2x8x8xf32>, vector<2x8x8xf32> -> vector<2x8x8xf32>
    "tpu.trace_stop"() : () -> ()
    %96 = vector.extract_strided_slice %11 {offsets = [0, 16], sizes = [1, 8], strides = [1, 1]} : vector<1x32xf32> to vector<1x8xf32>
    %97 = vector.shape_cast %96 : vector<1x8xf32> to vector<1x1x8xf32>
    %98 = vector.broadcast %97 : vector<1x1x8xf32> to vector<2x8x8xf32>
    %99 = arith.addf %95, %98 : vector<2x8x8xf32>
    %100 = vector.extract_strided_slice %15 {offsets = [0, 0, 24], sizes = [2, 8, 8], strides = [1, 1, 1]} : vector<2x8x32xf32> to vector<2x8x8xf32>
    %101 = vector.extract_strided_slice %13 {offsets = [0, 0, 7], sizes = [2, 8, 1], strides = [1, 1, 1]} : vector<2x8x8xf32> to vector<2x8x1xf32>
    %102 = vector.extract_strided_slice %14 {offsets = [0, 3, 0], sizes = [2, 1, 8], strides = [1, 1, 1]} : vector<2x8x8xf32> to vector<2x1x8xf32>
    %103 = vector.broadcast %101 : vector<2x8x1xf32> to vector<2x8x8xf32>
    %104 = vector.broadcast %102 : vector<2x1x8xf32> to vector<2x8x8xf32>
    %105 = arith.addf %103, %104 : vector<2x8x8xf32>
    %cst_29 = arith.constant 0.000000e+00 : f32
    %106 = vector.broadcast %cst_29 : f32 to vector<2x8x8xf32>
    %107 = arith.cmpf ogt, %105, %106 : vector<2x8x8xf32>
    %cst_30 = arith.constant 2.000000e-01 : f32
    %108 = vector.broadcast %cst_30 : f32 to vector<2x8x8xf32>
    %109 = arith.mulf %108, %105 : vector<2x8x8xf32>
    %110 = arith.select %107, %105, %109 : vector<2x8x8xi1>, vector<2x8x8xf32>
    %111 = vector.shape_cast %5 : vector<8x8xf32> to vector<1x8x8xf32>
    %112 = vector.broadcast %111 : vector<1x8x8xf32> to vector<2x8x8xf32>
    %113 = arith.addf %110, %112 : vector<2x8x8xf32>
    %cst_31 = arith.constant dense<0xFF800000> : vector<2x8xf32>
    %114 = vector.multi_reduction <maximumf>, %113, %cst_31 [2] : vector<2x8x8xf32> to vector<2x8xf32>
    %115 = vector.shape_cast %114 : vector<2x8xf32> to vector<2x8x1xf32>
    %116 = vector.broadcast %115 : vector<2x8x1xf32> to vector<2x8x8xf32>
    %117 = arith.subf %113, %116 : vector<2x8x8xf32>
    %118 = math.exp %117 : vector<2x8x8xf32>
    %cst_32 = arith.constant dense<0.000000e+00> : vector<2x8xf32>
    %119 = vector.multi_reduction <add>, %118, %cst_32 [2] : vector<2x8x8xf32> to vector<2x8xf32>
    %120 = vector.shape_cast %119 : vector<2x8xf32> to vector<2x8x1xf32>
    %121 = vector.broadcast %120 : vector<2x8x1xf32> to vector<2x8x8xf32>
    %122 = arith.divf %118, %121 : vector<2x8x8xf32>
    "tpu.trace_start"() <{level = 10 : i32, message = "bvu,buc->bvc"}> : () -> ()
    %cst_33 = arith.constant dense<0.000000e+00> : vector<2x8x8xf32>
    %123 = tpu.matmul %122, %100, %cst_33 {dimension_numbers = #tpu.dot_dimension_numbers<[2], [1], [1], [2], [0, 0, 0, 1, 1, 2], [0], [0]>} : vector<2x8x8xf32>, vector<2x8x8xf32>, vector<2x8x8xf32> -> vector<2x8x8xf32>
    "tpu.trace_stop"() : () -> ()
    %124 = vector.extract_strided_slice %11 {offsets = [0, 24], sizes = [1, 8], strides = [1, 1]} : vector<1x32xf32> to vector<1x8xf32>
    %125 = vector.shape_cast %124 : vector<1x8xf32> to vector<1x1x8xf32>
    %126 = vector.broadcast %125 : vector<1x1x8xf32> to vector<2x8x8xf32>
    %127 = arith.addf %123, %126 : vector<2x8x8xf32>
    %c0_34 = arith.constant 0 : index
    %c0_35 = arith.constant 0 : index
    %128 = vector.load %arg5[%c0_34, %c0_35] : memref<32x32xf32, #tpu.memory_space<vmem>>, vector<32x32xf32>
    %cst_36 = arith.constant 0.000000e+00 : f32
    %129 = vector.broadcast %cst_36 : f32 to vector<16x32xf32>
    %130 = vector.shape_cast %43 : vector<2x8x8xf32> to vector<16x8xf32>
    %131 = vector.extract_strided_slice %128 {offsets = [0, 0], sizes = [8, 32], strides = [1, 1]} : vector<32x32xf32> to vector<8x32xf32>
    %cst_37 = arith.constant dense<0.000000e+00> : vector<16x32xf32>
    %132 = tpu.matmul %130, %131, %cst_37 {dimension_numbers = #tpu.dot_dimension_numbers<[1], [0], [0], [1], [0, 0, 1, 1], [], []>} : vector<16x8xf32>, vector<8x32xf32>, vector<16x32xf32> -> vector<16x32xf32>
    %133 = arith.addf %129, %132 : vector<16x32xf32>
    %134 = vector.shape_cast %71 : vector<2x8x8xf32> to vector<16x8xf32>
    %135 = vector.extract_strided_slice %128 {offsets = [8, 0], sizes = [8, 32], strides = [1, 1]} : vector<32x32xf32> to vector<8x32xf32>
    %cst_38 = arith.constant dense<0.000000e+00> : vector<16x32xf32>
    %136 = tpu.matmul %134, %135, %cst_38 {dimension_numbers = #tpu.dot_dimension_numbers<[1], [0], [0], [1], [0, 0, 1, 1], [], []>} : vector<16x8xf32>, vector<8x32xf32>, vector<16x32xf32> -> vector<16x32xf32>
    %137 = arith.addf %133, %136 : vector<16x32xf32>
    %138 = vector.shape_cast %99 : vector<2x8x8xf32> to vector<16x8xf32>
    %139 = vector.extract_strided_slice %128 {offsets = [16, 0], sizes = [8, 32], strides = [1, 1]} : vector<32x32xf32> to vector<8x32xf32>
    %cst_39 = arith.constant dense<0.000000e+00> : vector<16x32xf32>
    %140 = tpu.matmul %138, %139, %cst_39 {dimension_numbers = #tpu.dot_dimension_numbers<[1], [0], [0], [1], [0, 0, 1, 1], [], []>} : vector<16x8xf32>, vector<8x32xf32>, vector<16x32xf32> -> vector<16x32xf32>
    %141 = arith.addf %137, %140 : vector<16x32xf32>
    %142 = vector.shape_cast %127 : vector<2x8x8xf32> to vector<16x8xf32>
    %143 = vector.extract_strided_slice %128 {offsets = [24, 0], sizes = [8, 32], strides = [1, 1]} : vector<32x32xf32> to vector<8x32xf32>
    %cst_40 = arith.constant dense<0.000000e+00> : vector<16x32xf32>
    %144 = tpu.matmul %142, %143, %cst_40 {dimension_numbers = #tpu.dot_dimension_numbers<[1], [0], [0], [1], [0, 0, 1, 1], [], []>} : vector<16x8xf32>, vector<8x32xf32>, vector<16x32xf32> -> vector<16x32xf32>
    %145 = arith.addf %141, %144 : vector<16x32xf32>
    %c0_41 = arith.constant 0 : index
    %c0_42 = arith.constant 0 : index
    %146 = vector.load %arg6[%c0_41, %c0_42] : memref<32x8xf32, #tpu.memory_space<vmem>>, vector<32x8xf32>
    %c0_43 = arith.constant 0 : index
    %c0_44 = arith.constant 0 : index
    %147 = vector.load %arg7[%c0_43, %c0_44] : memref<1x32xf32, #tpu.memory_space<vmem>>, vector<1x32xf32>
    %cst_45 = arith.constant dense<0.000000e+00> : vector<16x8xf32>
    %148 = tpu.matmul %145, %146, %cst_45 {dimension_numbers = #tpu.dot_dimension_numbers<[1], [0], [0], [1], [0, 0, 1, 1], [], []>} : vector<16x32xf32>, vector<32x8xf32>, vector<16x8xf32> -> vector<16x8xf32>
    %149 = vector.shape_cast %148 : vector<16x8xf32> to vector<2x8x8xf32>
    %150 = tpu.transpose %149, [0, 2, 1] : vector<2x8x8xf32> -> vector<2x8x8xf32>
    %151 = vector.shape_cast %145 : vector<16x32xf32> to vector<2x8x32xf32>
    %152 = vector.extract_strided_slice %151 {offsets = [0, 0, 0], sizes = [2, 8, 8], strides = [1, 1, 1]} : vector<2x8x32xf32> to vector<2x8x8xf32>
    %153 = vector.extract_strided_slice %149 {offsets = [0, 0, 4], sizes = [2, 8, 1], strides = [1, 1, 1]} : vector<2x8x8xf32> to vector<2x8x1xf32>
    %154 = vector.extract_strided_slice %150 {offsets = [0, 0, 0], sizes = [2, 1, 8], strides = [1, 1, 1]} : vector<2x8x8xf32> to vector<2x1x8xf32>
    %155 = vector.broadcast %153 : vector<2x8x1xf32> to vector<2x8x8xf32>
    %156 = vector.broadcast %154 : vector<2x1x8xf32> to vector<2x8x8xf32>
    %157 = arith.addf %155, %156 : vector<2x8x8xf32>
    %cst_46 = arith.constant 0.000000e+00 : f32
    %158 = vector.broadcast %cst_46 : f32 to vector<2x8x8xf32>
    %159 = arith.cmpf ogt, %157, %158 : vector<2x8x8xf32>
    %cst_47 = arith.constant 2.000000e-01 : f32
    %160 = vector.broadcast %cst_47 : f32 to vector<2x8x8xf32>
    %161 = arith.mulf %160, %157 : vector<2x8x8xf32>
    %162 = arith.select %159, %157, %161 : vector<2x8x8xi1>, vector<2x8x8xf32>
    %163 = vector.shape_cast %5 : vector<8x8xf32> to vector<1x8x8xf32>
    %164 = vector.broadcast %163 : vector<1x8x8xf32> to vector<2x8x8xf32>
    %165 = arith.addf %162, %164 : vector<2x8x8xf32>
    %cst_48 = arith.constant dense<0xFF800000> : vector<2x8xf32>
    %166 = vector.multi_reduction <maximumf>, %165, %cst_48 [2] : vector<2x8x8xf32> to vector<2x8xf32>
    %167 = vector.shape_cast %166 : vector<2x8xf32> to vector<2x8x1xf32>
    %168 = vector.broadcast %167 : vector<2x8x1xf32> to vector<2x8x8xf32>
    %169 = arith.subf %165, %168 : vector<2x8x8xf32>
    %170 = math.exp %169 : vector<2x8x8xf32>
    %cst_49 = arith.constant dense<0.000000e+00> : vector<2x8xf32>
    %171 = vector.multi_reduction <add>, %170, %cst_49 [2] : vector<2x8x8xf32> to vector<2x8xf32>
    %172 = vector.shape_cast %171 : vector<2x8xf32> to vector<2x8x1xf32>
    %173 = vector.broadcast %172 : vector<2x8x1xf32> to vector<2x8x8xf32>
    %174 = arith.divf %170, %173 : vector<2x8x8xf32>
    "tpu.trace_start"() <{level = 10 : i32, message = "bvu,buc->bvc"}> : () -> ()
    %cst_50 = arith.constant dense<0.000000e+00> : vector<2x8x8xf32>
    %175 = tpu.matmul %174, %152, %cst_50 {dimension_numbers = #tpu.dot_dimension_numbers<[2], [1], [1], [2], [0, 0, 0, 1, 1, 2], [0], [0]>} : vector<2x8x8xf32>, vector<2x8x8xf32>, vector<2x8x8xf32> -> vector<2x8x8xf32>
    "tpu.trace_stop"() : () -> ()
    %176 = vector.extract_strided_slice %147 {offsets = [0, 0], sizes = [1, 8], strides = [1, 1]} : vector<1x32xf32> to vector<1x8xf32>
    %177 = vector.shape_cast %176 : vector<1x8xf32> to vector<1x1x8xf32>
    %178 = vector.broadcast %177 : vector<1x1x8xf32> to vector<2x8x8xf32>
    %179 = arith.addf %175, %178 : vector<2x8x8xf32>
    %180 = vector.extract_strided_slice %151 {offsets = [0, 0, 8], sizes = [2, 8, 8], strides = [1, 1, 1]} : vector<2x8x32xf32> to vector<2x8x8xf32>
    %181 = vector.extract_strided_slice %149 {offsets = [0, 0, 5], sizes = [2, 8, 1], strides = [1, 1, 1]} : vector<2x8x8xf32> to vector<2x8x1xf32>
    %182 = vector.extract_strided_slice %150 {offsets = [0, 1, 0], sizes = [2, 1, 8], strides = [1, 1, 1]} : vector<2x8x8xf32> to vector<2x1x8xf32>
    %183 = vector.broadcast %181 : vector<2x8x1xf32> to vector<2x8x8xf32>
    %184 = vector.broadcast %182 : vector<2x1x8xf32> to vector<2x8x8xf32>
    %185 = arith.addf %183, %184 : vector<2x8x8xf32>
    %cst_51 = arith.constant 0.000000e+00 : f32
    %186 = vector.broadcast %cst_51 : f32 to vector<2x8x8xf32>
    %187 = arith.cmpf ogt, %185, %186 : vector<2x8x8xf32>
    %cst_52 = arith.constant 2.000000e-01 : f32
    %188 = vector.broadcast %cst_52 : f32 to vector<2x8x8xf32>
    %189 = arith.mulf %188, %185 : vector<2x8x8xf32>
    %190 = arith.select %187, %185, %189 : vector<2x8x8xi1>, vector<2x8x8xf32>
    %191 = vector.shape_cast %5 : vector<8x8xf32> to vector<1x8x8xf32>
    %192 = vector.broadcast %191 : vector<1x8x8xf32> to vector<2x8x8xf32>
    %193 = arith.addf %190, %192 : vector<2x8x8xf32>
    %cst_53 = arith.constant dense<0xFF800000> : vector<2x8xf32>
    %194 = vector.multi_reduction <maximumf>, %193, %cst_53 [2] : vector<2x8x8xf32> to vector<2x8xf32>
    %195 = vector.shape_cast %194 : vector<2x8xf32> to vector<2x8x1xf32>
    %196 = vector.broadcast %195 : vector<2x8x1xf32> to vector<2x8x8xf32>
    %197 = arith.subf %193, %196 : vector<2x8x8xf32>
    %198 = math.exp %197 : vector<2x8x8xf32>
    %cst_54 = arith.constant dense<0.000000e+00> : vector<2x8xf32>
    %199 = vector.multi_reduction <add>, %198, %cst_54 [2] : vector<2x8x8xf32> to vector<2x8xf32>
    %200 = vector.shape_cast %199 : vector<2x8xf32> to vector<2x8x1xf32>
    %201 = vector.broadcast %200 : vector<2x8x1xf32> to vector<2x8x8xf32>
    %202 = arith.divf %198, %201 : vector<2x8x8xf32>
    "tpu.trace_start"() <{level = 10 : i32, message = "bvu,buc->bvc"}> : () -> ()
    %cst_55 = arith.constant dense<0.000000e+00> : vector<2x8x8xf32>
    %203 = tpu.matmul %202, %180, %cst_55 {dimension_numbers = #tpu.dot_dimension_numbers<[2], [1], [1], [2], [0, 0, 0, 1, 1, 2], [0], [0]>} : vector<2x8x8xf32>, vector<2x8x8xf32>, vector<2x8x8xf32> -> vector<2x8x8xf32>
    "tpu.trace_stop"() : () -> ()
    %204 = vector.extract_strided_slice %147 {offsets = [0, 8], sizes = [1, 8], strides = [1, 1]} : vector<1x32xf32> to vector<1x8xf32>
    %205 = vector.shape_cast %204 : vector<1x8xf32> to vector<1x1x8xf32>
    %206 = vector.broadcast %205 : vector<1x1x8xf32> to vector<2x8x8xf32>
    %207 = arith.addf %203, %206 : vector<2x8x8xf32>
    %208 = vector.extract_strided_slice %151 {offsets = [0, 0, 16], sizes = [2, 8, 8], strides = [1, 1, 1]} : vector<2x8x32xf32> to vector<2x8x8xf32>
    %209 = vector.extract_strided_slice %149 {offsets = [0, 0, 6], sizes = [2, 8, 1], strides = [1, 1, 1]} : vector<2x8x8xf32> to vector<2x8x1xf32>
    %210 = vector.extract_strided_slice %150 {offsets = [0, 2, 0], sizes = [2, 1, 8], strides = [1, 1, 1]} : vector<2x8x8xf32> to vector<2x1x8xf32>
    %211 = vector.broadcast %209 : vector<2x8x1xf32> to vector<2x8x8xf32>
    %212 = vector.broadcast %210 : vector<2x1x8xf32> to vector<2x8x8xf32>
    %213 = arith.addf %211, %212 : vector<2x8x8xf32>
    %cst_56 = arith.constant 0.000000e+00 : f32
    %214 = vector.broadcast %cst_56 : f32 to vector<2x8x8xf32>
    %215 = arith.cmpf ogt, %213, %214 : vector<2x8x8xf32>
    %cst_57 = arith.constant 2.000000e-01 : f32
    %216 = vector.broadcast %cst_57 : f32 to vector<2x8x8xf32>
    %217 = arith.mulf %216, %213 : vector<2x8x8xf32>
    %218 = arith.select %215, %213, %217 : vector<2x8x8xi1>, vector<2x8x8xf32>
    %219 = vector.shape_cast %5 : vector<8x8xf32> to vector<1x8x8xf32>
    %220 = vector.broadcast %219 : vector<1x8x8xf32> to vector<2x8x8xf32>
    %221 = arith.addf %218, %220 : vector<2x8x8xf32>
    %cst_58 = arith.constant dense<0xFF800000> : vector<2x8xf32>
    %222 = vector.multi_reduction <maximumf>, %221, %cst_58 [2] : vector<2x8x8xf32> to vector<2x8xf32>
    %223 = vector.shape_cast %222 : vector<2x8xf32> to vector<2x8x1xf32>
    %224 = vector.broadcast %223 : vector<2x8x1xf32> to vector<2x8x8xf32>
    %225 = arith.subf %221, %224 : vector<2x8x8xf32>
    %226 = math.exp %225 : vector<2x8x8xf32>
    %cst_59 = arith.constant dense<0.000000e+00> : vector<2x8xf32>
    %227 = vector.multi_reduction <add>, %226, %cst_59 [2] : vector<2x8x8xf32> to vector<2x8xf32>
    %228 = vector.shape_cast %227 : vector<2x8xf32> to vector<2x8x1xf32>
    %229 = vector.broadcast %228 : vector<2x8x1xf32> to vector<2x8x8xf32>
    %230 = arith.divf %226, %229 : vector<2x8x8xf32>
    "tpu.trace_start"() <{level = 10 : i32, message = "bvu,buc->bvc"}> : () -> ()
    %cst_60 = arith.constant dense<0.000000e+00> : vector<2x8x8xf32>
    %231 = tpu.matmul %230, %208, %cst_60 {dimension_numbers = #tpu.dot_dimension_numbers<[2], [1], [1], [2], [0, 0, 0, 1, 1, 2], [0], [0]>} : vector<2x8x8xf32>, vector<2x8x8xf32>, vector<2x8x8xf32> -> vector<2x8x8xf32>
    "tpu.trace_stop"() : () -> ()
    %232 = vector.extract_strided_slice %147 {offsets = [0, 16], sizes = [1, 8], strides = [1, 1]} : vector<1x32xf32> to vector<1x8xf32>
    %233 = vector.shape_cast %232 : vector<1x8xf32> to vector<1x1x8xf32>
    %234 = vector.broadcast %233 : vector<1x1x8xf32> to vector<2x8x8xf32>
    %235 = arith.addf %231, %234 : vector<2x8x8xf32>
    %236 = vector.extract_strided_slice %151 {offsets = [0, 0, 24], sizes = [2, 8, 8], strides = [1, 1, 1]} : vector<2x8x32xf32> to vector<2x8x8xf32>
    %237 = vector.extract_strided_slice %149 {offsets = [0, 0, 7], sizes = [2, 8, 1], strides = [1, 1, 1]} : vector<2x8x8xf32> to vector<2x8x1xf32>
    %238 = vector.extract_strided_slice %150 {offsets = [0, 3, 0], sizes = [2, 1, 8], strides = [1, 1, 1]} : vector<2x8x8xf32> to vector<2x1x8xf32>
    %239 = vector.broadcast %237 : vector<2x8x1xf32> to vector<2x8x8xf32>
    %240 = vector.broadcast %238 : vector<2x1x8xf32> to vector<2x8x8xf32>
    %241 = arith.addf %239, %240 : vector<2x8x8xf32>
    %cst_61 = arith.constant 0.000000e+00 : f32
    %242 = vector.broadcast %cst_61 : f32 to vector<2x8x8xf32>
    %243 = arith.cmpf ogt, %241, %242 : vector<2x8x8xf32>
    %cst_62 = arith.constant 2.000000e-01 : f32
    %244 = vector.broadcast %cst_62 : f32 to vector<2x8x8xf32>
    %245 = arith.mulf %244, %241 : vector<2x8x8xf32>
    %246 = arith.select %243, %241, %245 : vector<2x8x8xi1>, vector<2x8x8xf32>
    %247 = vector.shape_cast %5 : vector<8x8xf32> to vector<1x8x8xf32>
    %248 = vector.broadcast %247 : vector<1x8x8xf32> to vector<2x8x8xf32>
    %249 = arith.addf %246, %248 : vector<2x8x8xf32>
    %cst_63 = arith.constant dense<0xFF800000> : vector<2x8xf32>
    %250 = vector.multi_reduction <maximumf>, %249, %cst_63 [2] : vector<2x8x8xf32> to vector<2x8xf32>
    %251 = vector.shape_cast %250 : vector<2x8xf32> to vector<2x8x1xf32>
    %252 = vector.broadcast %251 : vector<2x8x1xf32> to vector<2x8x8xf32>
    %253 = arith.subf %249, %252 : vector<2x8x8xf32>
    %254 = math.exp %253 : vector<2x8x8xf32>
    %cst_64 = arith.constant dense<0.000000e+00> : vector<2x8xf32>
    %255 = vector.multi_reduction <add>, %254, %cst_64 [2] : vector<2x8x8xf32> to vector<2x8xf32>
    %256 = vector.shape_cast %255 : vector<2x8xf32> to vector<2x8x1xf32>
    %257 = vector.broadcast %256 : vector<2x8x1xf32> to vector<2x8x8xf32>
    %258 = arith.divf %254, %257 : vector<2x8x8xf32>
    "tpu.trace_start"() <{level = 10 : i32, message = "bvu,buc->bvc"}> : () -> ()
    %cst_65 = arith.constant dense<0.000000e+00> : vector<2x8x8xf32>
    %259 = tpu.matmul %258, %236, %cst_65 {dimension_numbers = #tpu.dot_dimension_numbers<[2], [1], [1], [2], [0, 0, 0, 1, 1, 2], [0], [0]>} : vector<2x8x8xf32>, vector<2x8x8xf32>, vector<2x8x8xf32> -> vector<2x8x8xf32>
    "tpu.trace_stop"() : () -> ()
    %260 = vector.extract_strided_slice %147 {offsets = [0, 24], sizes = [1, 8], strides = [1, 1]} : vector<1x32xf32> to vector<1x8xf32>
    %261 = vector.shape_cast %260 : vector<1x8xf32> to vector<1x1x8xf32>
    %262 = vector.broadcast %261 : vector<1x1x8xf32> to vector<2x8x8xf32>
    %263 = arith.addf %259, %262 : vector<2x8x8xf32>
    %264 = arith.addf %179, %207 : vector<2x8x8xf32>
    %265 = arith.addf %264, %235 : vector<2x8x8xf32>
    %266 = arith.addf %265, %263 : vector<2x8x8xf32>
    %cst_66 = arith.constant 2.500000e-01 : f32
    %267 = vector.broadcast %cst_66 : f32 to vector<2x8x8xf32>
    %268 = arith.mulf %266, %267 : vector<2x8x8xf32>
    %269 = vector.extract_strided_slice %268 {offsets = [0, 2, 0], sizes = [2, 6, 8], strides = [1, 1, 1]} : vector<2x8x8xf32> to vector<2x6x8xf32>
    %270 = vector.extract_strided_slice %268 {offsets = [0, 0, 0], sizes = [2, 1, 8], strides = [1, 1, 1]} : vector<2x8x8xf32> to vector<2x1x8xf32>
    %271 = vector.shape_cast %270 : vector<2x1x8xf32> to vector<2x8xf32>
    %c0_67 = arith.constant 0 : index
    %c0_68 = arith.constant 0 : index
    %c0_69 = arith.constant 0 : index
    %272 = vector.load %arg8[%c0_67, %c0_68, %c0_69] : memref<5x2x8xf32, #tpu.memory_space<vmem>>, vector<1x2x8xf32>
    %273 = vector.shape_cast %272 : vector<1x2x8xf32> to vector<2x8xf32>
    %274 = vector.shape_cast %271 : vector<2x8xf32> to vector<1x2x8xf32>
    tpu.vector_store %arg8[%c0_67, %c0_68, %c0_69], %274 {strides = array<i32>} : memref<5x2x8xf32, #tpu.memory_space<vmem>>, vector<1x2x8xf32>,
    %275 = vector.extract_strided_slice %268 {offsets = [0, 1, 0], sizes = [2, 1, 8], strides = [1, 1, 1]} : vector<2x8x8xf32> to vector<2x1x8xf32>
    %276 = vector.shape_cast %275 : vector<2x1x8xf32> to vector<2x8xf32>
    %c1 = arith.constant 1 : index
    %c0_70 = arith.constant 0 : index
    %c0_71 = arith.constant 0 : index
    %277 = vector.load %arg8[%c1, %c0_70, %c0_71] : memref<5x2x8xf32, #tpu.memory_space<vmem>>, vector<1x2x8xf32>
    %278 = vector.shape_cast %277 : vector<1x2x8xf32> to vector<2x8xf32>
    %279 = vector.shape_cast %276 : vector<2x8xf32> to vector<1x2x8xf32>
    tpu.vector_store %arg8[%c1, %c0_70, %c0_71], %279 {strides = array<i32>} : memref<5x2x8xf32, #tpu.memory_space<vmem>>, vector<1x2x8xf32>,
    %cst_72 = arith.constant dense<0xFF800000> : vector<2x8xf32>
    %280 = vector.multi_reduction <maximumf>, %269, %cst_72 [1] : vector<2x6x8xf32> to vector<2x8xf32>
    %c2 = arith.constant 2 : index
    %c0_73 = arith.constant 0 : index
    %c0_74 = arith.constant 0 : index
    %281 = vector.load %arg8[%c2, %c0_73, %c0_74] : memref<5x2x8xf32, #tpu.memory_space<vmem>>, vector<1x2x8xf32>
    %282 = vector.shape_cast %281 : vector<1x2x8xf32> to vector<2x8xf32>
    %283 = vector.shape_cast %280 : vector<2x8xf32> to vector<1x2x8xf32>
    tpu.vector_store %arg8[%c2, %c0_73, %c0_74], %283 {strides = array<i32>} : memref<5x2x8xf32, #tpu.memory_space<vmem>>, vector<1x2x8xf32>,
    %cst_75 = arith.constant dense<0x7F800000> : vector<2x8xf32>
    %284 = vector.multi_reduction <minimumf>, %269, %cst_75 [1] : vector<2x6x8xf32> to vector<2x8xf32>
    %c3 = arith.constant 3 : index
    %c0_76 = arith.constant 0 : index
    %c0_77 = arith.constant 0 : index
    %285 = vector.load %arg8[%c3, %c0_76, %c0_77] : memref<5x2x8xf32, #tpu.memory_space<vmem>>, vector<1x2x8xf32>
    %286 = vector.shape_cast %285 : vector<1x2x8xf32> to vector<2x8xf32>
    %287 = vector.shape_cast %284 : vector<2x8xf32> to vector<1x2x8xf32>
    tpu.vector_store %arg8[%c3, %c0_76, %c0_77], %287 {strides = array<i32>} : memref<5x2x8xf32, #tpu.memory_space<vmem>>, vector<1x2x8xf32>,
    %cst_78 = arith.constant dense<0.000000e+00> : vector<2x8xf32>
    %288 = vector.multi_reduction <add>, %269, %cst_78 [1] : vector<2x6x8xf32> to vector<2x8xf32>
    %cst_79 = arith.constant 0.166666672 : f32
    %289 = vector.broadcast %cst_79 : f32 to vector<2x8xf32>
    %290 = arith.mulf %288, %289 : vector<2x8xf32>
    %c4 = arith.constant 4 : index
    %c0_80 = arith.constant 0 : index
    %c0_81 = arith.constant 0 : index
    %291 = vector.load %arg8[%c4, %c0_80, %c0_81] : memref<5x2x8xf32, #tpu.memory_space<vmem>>, vector<1x2x8xf32>
    %292 = vector.shape_cast %291 : vector<1x2x8xf32> to vector<2x8xf32>
    %293 = vector.shape_cast %290 : vector<2x8xf32> to vector<1x2x8xf32>
    tpu.vector_store %arg8[%c4, %c0_80, %c0_81], %293 {strides = array<i32>} : memref<5x2x8xf32, #tpu.memory_space<vmem>>, vector<1x2x8xf32>,
    return
  }
}

</mosaic_0001>

<bundles_post_ra>
// kernel: tpu_custom_call.1
= control target key start
LH: loop header
LB: loop body
LE: loop exit
PB: predicated region body
PF: predicated region fallthrough
CT: control target
= control target key end

     0   :  { %vm37_vm0 = vcmask 130048   ;;  %s3294_s0 = inlined_call_operand.vmem [shape: f32[2,8,16], index: 0, kind: input, shape index: {}]   ;;  %s3295_s1 = inlined_call_operand.vmem [shape: f32[8,8], index: 1, kind: input, shape index: {}]   ;;  %s3296_s2 = inlined_call_operand.vmem [shape: f32[16,32], index: 2, kind: input, shape index: {}]   ;;  %s3297_s3 = inlined_call_operand.vmem [shape: f32[32,8], index: 3, kind: input, shape index: {}]   ;;  %s3298_s4 = inlined_call_operand.vmem [shape: f32[1,32], index: 4, kind: input, shape index: {}]   ;;  %s3299_s5 = inlined_call_operand.vmem [shape: f32[32,32], index: 5, kind: input, shape index: {}]   ;;  %s3300_s6 = inlined_call_operand.vmem [shape: f32[32,8], index: 6, kind: input, shape index: {}]   ;;  %s3301_s7 = inlined_call_operand.vmem [shape: f32[1,32], index: 7, kind: input, shape index: {}]   ;;  %s3302_s8 = inlined_call_operand.hbm [shape: f32[5,2,8], index: 8, kind: output, shape index: {}]  }
   0x1   :  { %v35_v0 = vld [vmem:[%s3296_s2] sm:$0xff]  ;;  %v36_v1 = vld [vmem:[%s3296_s2 + $0x8] sm:$0xff]  ;;  %v121_v7 = vld [vmem:[%s3297_s3 + $0x10] sm:$0xff] }
   0x2   :  { %v33_v2 = vld [vmem:[%s3294_s0] sm:$0xff]  ;;  %v2702_v3 = vpack.c.bf16 %v36_v1, %v35_v0  ;;  %v120_v5 = vld [vmem:[%s3297_s3 + $0x8] sm:$0xff]  ;;  %v122_v8 = vld [vmem:[%s3297_s3 + $0x18] sm:$0xff] }
   0x3   :  { %2577 = vmatprep.mubr.msk.f32.mxu1 %vm37_vm0, %v33_v2  ;;  %v119_v4 = vld [vmem:[%s3297_s3] sm:$0xff] }
   0x4   :  { %v2706_v6 = vpack.c.bf16 %v120_v5, %v119_v4 }
   0x5   :  { %13 = vsyncpa [#allocation3], 0  ;;  %2703 = vmatprep.subr.bf16.mxu1 %v2702_v3  ;;  %v34_v9 = vld [vmem:[%s3294_s0 + $0x8] sm:$0xff]  ;;  %v2710_v10 = vpack.c.bf16 %v122_v8, %v121_v7  ;;  %v2864_v11 = vmov 0.0   ;;  %v2865_v12 = vmov 5   ;;  %v2866_v13 = vmov 4  }
   0x6   :  { %2705 = vmatpush3.bf16.msra.mxu1 %v2702_v3  ;;  %2591 = vmatprep.subr.mxu0 %v2864_v11  ;;  %vm124_vm1 = vcmask 261120   ;;  %v2867_v18 = vmov 6   ;;  %v2868_v19 = vmov 7   ;;  %v280_v20 = vlaneseq  ;;  %v30_v25 = vld [vmem:[%s3295_s1] sm:$0xff]  ;;  %s2870_s1 = smov 120   ;;  %s2871_s20 = smov 112  }
   0x7   :  { %2707 = vmatprep.subr.bf16.mxu1 %v2706_v6  ;;  %2762 = vset.pattern.permute.xlu1 %v2865_v12  ;;  %vm31_vm2 = vcmp.gt.f32.partialorder %v30_v25, 0.0  ;;  %v2869_v30 = vmov -1e+30   ;;  %vm298_vm4 = vcmask 64512   ;;  %vm2872_vm12 = vmmov 0   ;;  %s2873_s21 = smov 104  }
   0x8   :  { %2761 = vset.pattern.permute.xlu0 %v2866_v13  ;;  %v281_v22 = vshrl.u32 %v280_v20, 7  ;;  %v2973_v31 = vsel %vm31_vm2, 0.0, %v2869_v30  ;;  %2593 = vmatprep.mubr.msk.f32.mxu0 %vm2872_vm12, %v2864_v11 }
   0x9   :  { %2578 = vmatmul.mubr.msk.f32.vlgmr.msra.gmra.mrb[0].mxu1 %vm37_vm0, %v34_v9 }
   0xa   :  { %2709 = vmatpush3.bf16.msra.mxu1 %v2706_v6  ;;  %v2967_v24 = vsub.s32 0, %v281_v22  ;;  %v2980_v38 = vsub.s32 1, %v281_v22  ;;  %v2987_v52 = vsub.s32 2, %v281_v22  ;;  %v2997_v60 = vsub.s32 3, %v281_v22 }
   0xb   :  { %2711 = vmatprep.subr.bf16.mxu1 %v2710_v10 }
   0xe   :  { %2713 = vmatpush3.bf16.msra.mxu1 %v2710_v10 }
   0xf   :  { %2601 = vmatprep.subr.mxu1 %v2864_v11 }
  0xdc   :  { %v2950_v14 = vpop.f32.mrb[0].mxu1 }
  0xdd   :  { %v2952_v15 = vpop.f32.mrb[1].mxu1 }
  0xde   :  { %2588 = vmatprep.mubr.msk.f32.mxu1 %vm124_vm1, %v2952_v15  ;;  %2592 = vmatpush3.msra.mxu0 %v2952_v15 }
  0xdf   :  { %2589 = vmatmul.mubr.msk.f32.vlgmr.msra.gmra.mrb[2].mxu1 %vm124_vm1, %v2950_v14  ;;  %2596 = vmatprep.subr.mxu0 %v2864_v11 }
  0xe0   :  { %2603 = vmatprep.mubr.msk.f32.mxu1 %vm2872_vm12, %v2864_v11 }
 0x1b2   :  { %v2590_v16 = vpop.f32.mrb[2].mxu1 }
 0x1b3   :  { %478 = vperm.xlu1 %2762, %v2590_v16   ;;  %277 = vperm.xlu0 %2761, %v2590_v16   ;;  %v197_v17 = vpop.f32.mrb[3].mxu1 }
 0x1b7   :  { %2763 = vset.pattern.permute.xlu1 %v2867_v18  ;;  %272 = vperm.xlu0 %2761, %v197_v17  }
 0x1b8   :  { %681 = vperm.xlu1 %2763, %v2590_v16  }
 0x1bc   :  { %2764 = vset.pattern.permute.xlu1 %v2868_v19 }
 0x1bd   :  { %884 = vperm.xlu1 %2764, %v2590_v16  }
 0x1c1   :  { %2765 = vset.pattern.permute.xlu1 %v2865_v12 }
 0x1c2   :  { %474 = vperm.xlu1 %2765, %v197_v17  }
 0x1d5   :  { %238 = vxpose.xlu0.b32.start.end [1/1] (short) (narrow) %v2590_v16, 8 }
 0x1eb   :  { %206 = vxpose.xlu1.b32.start.end [1/1] (short) (narrow) %v197_v17, 8 }
 0x1fe   :  { %2766 = vset.pattern.permute.xlu0 %v2867_v18 }
 0x1ff   :  { %677 = vperm.xlu0 %2766, %v197_v17  }
 0x203   :  { %2767 = vset.pattern.permute.xlu0 %v2868_v19 }
 0x204   :  { %880 = vperm.xlu0 %2767, %v197_v17  }
 0x208   :  { %2769 = vset.pattern.permute.xlu0 %v2865_v12 }
 0x209   :  { %2768 = vset.pattern.permute.xlu1 %v2866_v13 }
 0x232   :  { %v278_v21 = vpop.permute.xlu0 %277  ;;  %v479_v26 = vpop.permute.xlu1 %478 }
 0x236   :  { %v273_v23 = vpop.permute.xlu0 %272 }
 0x237   :  { %v682_v33 = vpop.permute.xlu1 %681 }
 0x23c   :  { %v885_v37 = vpop.permute.xlu1 %884 }
 0x241   :  { %v475_v39 = vpop.permute.xlu1 %474 }
 0x255   :  { %v254_v27 = vpop.trf.xlu0 }
 0x256   :  { %v287_v28 = vrot.slane %v254_v27, %v2967_v24  ;;  %v488_v40 = vrot.slane %v254_v27, %v2980_v38  ;;  %v691_v57 = vrot.slane %v254_v27, %v2987_v52  ;;  %v894_v1 = vrot.slane %v254_v27, %v2997_v60 }
 0x258   :  { %v289_v29 = vadd.f32 %v287_v28, %v278_v21  ;;  %v490_v44 = vadd.f32 %v488_v40, %v479_v26  ;;  %v693_v61 = vadd.f32 %v691_v57, %v682_v33  ;;  %v896_v6 = vadd.f32 %v894_v1, %v885_v37 }
 0x25a   :  { %vm291_vm3 = vcmp.gt.f32.partialorder %v289_v29, 0.0  ;;  %v293_v32 = vmul.f32 0.2, %v289_v29  ;;  %v494_v51 = vmul.f32 0.2, %v490_v44  ;;  %vm492_vm7 = vcmp.gt.f32.partialorder %v490_v44, 0.0 }
 0x25b   :  { %v697_v3 = vmul.f32 0.2, %v693_v61  ;;  %vm695_vm8 = vcmp.gt.f32.partialorder %v693_v61, 0.0  ;;  %v900_v22 = vmul.f32 0.2, %v896_v6  ;;  %vm898_vm11 = vcmp.gt.f32.partialorder %v896_v6, 0.0 }
 0x25c   :  { %v295_v34 = vsel %vm291_vm3, %v289_v29, %v293_v32  ;;  %v496_v56 = vsel %vm492_vm7, %v490_v44, %v494_v51  ;;  %vm2442_vm7 = vcmask 62464  }
 0x25d   :  { %v2976_v35 = vadd.f32 %v295_v34, %v2973_v31  ;;  %v498_v59 = vadd.f32 %v496_v56, %v2973_v31  ;;  %v699_v9 = vsel %vm695_vm8, %v693_v61, %v697_v3  ;;  %v902_v27 = vsel %vm898_vm11, %v896_v6, %v900_v22 }
 0x25e   :  { %v701_v21 = vadd.f32 %v699_v9, %v2973_v31  ;;  %v904_v29 = vadd.f32 %v902_v27, %v2973_v31  ;;  %vm2389_vm8 = vcmask 58368  }
 0x25f   :  { %v302_v36 = vsel %vm298_vm4, %v2976_v35, -inf  ;;  %v502_v63 = vsel %vm298_vm4, %v498_v59, -inf }
 0x260   :  { %303 = vmax.xlane.f32.xlu1 %v302_v36  ;;  %v705_v25 = vsel %vm298_vm4, %v701_v21, -inf  ;;  %v908_v30 = vsel %vm298_vm4, %v904_v29, -inf }
 0x26b   :  { %v222_v41 = vpop.trf.xlu1 }
 0x26c   :  { %v283_v42 = vrot.slane %v222_v41, %v2967_v24  ;;  %v484_v43 = vrot.slane %v222_v41, %v2980_v38  ;;  %v687_v62 = vrot.slane %v222_v41, %v2987_v52  ;;  %v890_v5 = vrot.slane %v222_v41, %v2997_v60 }
 0x26e   :  { %v288_v45 = vadd.f32 %v283_v42, %v273_v23  ;;  %v489_v46 = vadd.f32 %v484_v43, %v475_v39 }
 0x270   :  { %vm290_vm5 = vcmp.gt.f32.partialorder %v288_v45, 0.0  ;;  %v292_v47 = vmul.f32 0.2, %v288_v45  ;;  %vm491_vm6 = vcmp.gt.f32.partialorder %v489_v46, 0.0  ;;  %v493_v48 = vmul.f32 0.2, %v489_v46 }
 0x271   :  { %521 = vrot.lane.b32.xlu1 %v2952_v15, %s2870_s1 }
 0x272   :  { %v294_v49 = vsel %vm290_vm5, %v288_v45, %v292_v47  ;;  %v495_v50 = vsel %vm491_vm6, %v489_v46, %v493_v48  ;;  %vm2397_vm6 = vcmask 64514  }
 0x273   :  { %v296_v53 = vadd.f32 %v294_v49, %v2973_v31  ;;  %v497_v55 = vadd.f32 %v495_v50, %v2973_v31 }
 0x275   :  { %724 = vrot.lane.b32.xlu1 %v2952_v15, %s2871_s20  ;;  %v299_v54 = vsel %vm298_vm4, %v296_v53, -inf  ;;  %v499_v58 = vsel %vm298_vm4, %v497_v55, -inf }
 0x276   :  { %300 = vmax.xlane.f32.xlu0 %v299_v54 }
 0x27a   :  { %500 = vmax.xlane.f32.xlu0 %v499_v58 }
 0x27e   :  { %v678_v0 = vpop.permute.xlu0 %677  ;;  %503 = vmax.xlane.f32.xlu0 %v502_v63 }
 0x27f   :  { %v692_v2 = vadd.f32 %v687_v62, %v678_v0 }
 0x281   :  { %vm694_vm9 = vcmp.gt.f32.partialorder %v692_v2, 0.0  ;;  %v696_v4 = vmul.f32 0.2, %v692_v2 }
 0x283   :  { %v881_v7 = vpop.permute.xlu0 %880  ;;  %v698_v8 = vsel %vm694_vm9, %v692_v2, %v696_v4  ;;  %vm2391_vm9 = vcmask 1042434  }
 0x284   :  { %v895_v10 = vadd.f32 %v890_v5, %v881_v7  ;;  %v700_v16 = vadd.f32 %v698_v8, %v2973_v31 }
 0x286   :  { %vm897_vm10 = vcmp.gt.f32.partialorder %v895_v10, 0.0  ;;  %v899_v17 = vmul.f32 0.2, %v895_v10  ;;  %v702_v20 = vsel %vm298_vm4, %v700_v16, -inf }
 0x287   :  { %703 = vmax.xlane.f32.xlu0 %v702_v20 }
 0x288   :  { %v901_v23 = vsel %vm897_vm10, %v895_v10, %v899_v17  ;;  %v3057_v17 = vld [vmem:[%s3298_s4] ss:$0 sm:$0xff]  ;;  %vm2395_vm10 = vcmask 59393  }
 0x289   :  { %v903_v26 = vadd.f32 %v901_v23, %v2973_v31 }
 0x28b   :  { %706 = vmax.xlane.f32.xlu0 %v705_v25  ;;  %v905_v28 = vsel %vm298_vm4, %v903_v26, -inf }
 0x28f   :  { %906 = vmax.xlane.f32.xlu0 %v905_v28 }
 0x293   :  { %909 = vmax.xlane.f32.xlu0 %v908_v30 }
 0x2ed   :  { %v304_v32 = vpop.xlane.xlu1 %303 }
 0x2ee   :  { %v306_v33 = vsub.f32 %v2976_v35, %v304_v32 }
 0x2f0   :  { %v309_v34 = vmul.f32 1.442695, %v306_v33 }
 0x2f1   :  { %v522_v36 = vpop.permute.xlu1 %521 }
 0x2f2   :  { %2776 = vpow2.f32 %v309_v34  ;;  %2602 = vmatpush3.msra.mxu1 %v522_v36 }
 0x2f3   :  { %2611 = vmatprep.subr.mxu1 %v2864_v11 }
 0x2f5   :  { %v725_v20 = vpop.permute.xlu1 %724 }
 0x2fc   :  { %v3013_v37 = vpop.eup %2776 }
 0x2fd   :  { %v314_v39 = vsel %vm298_vm4, %v3013_v37, 0.0 }
 0x2fe   :  { %315 = vadd.xlane.f32.xlu0 %v314_v39 }
 0x303   :  { %v301_v40 = vpop.xlane.xlu0 %300 }
 0x304   :  { %v305_v41 = vsub.f32 %v296_v53, %v301_v40 }
 0x306   :  { %v307_v42 = vmul.f32 1.442695, %v305_v41 }
 0x307   :  { %v501_v43 = vpop.xlane.xlu0 %500 }
 0x308   :  { %2778 = vpow2.f32 %v307_v42  ;;  %v505_v44 = vsub.f32 %v497_v55, %v501_v43 }
 0x30a   :  { %v507_v45 = vmul.f32 1.442695, %v505_v44 }
 0x30b   :  { %v504_v35 = vpop.xlane.xlu0 %503 }
 0x30c   :  { %2780 = vpow2.f32 %v507_v45  ;;  %v506_v46 = vsub.f32 %v498_v59, %v504_v35 }
 0x30e   :  { %v509_v47 = vmul.f32 1.442695, %v506_v46 }
 0x310   :  { %2782 = vpow2.f32 %v509_v47 }
 0x312   :  { %v2779_v48 = vpop.eup %2778 }
 0x313   :  { %v311_v49 = vsel %vm298_vm4, %v2779_v48, 0.0 }
 0x314   :  { %312 = vadd.xlane.f32.xlu1 %v311_v49  ;;  %v704_v55 = vpop.xlane.xlu0 %703 }
 0x315   :  { %v708_v58 = vsub.f32 %v700_v16, %v704_v55 }
 0x316   :  { %v3018_v50 = vpop.eup %2780 }
 0x317   :  { %v511_v51 = vsel %vm298_vm4, %v3018_v50, 0.0  ;;  %v710_v61 = vmul.f32 1.442695, %v708_v58 }
 0x318   :  { %512 = vadd.xlane.f32.xlu1 %v511_v51  ;;  %v707_v56 = vpop.xlane.xlu0 %706  ;;  %v1082_v51 = vld [vmem:[%s3299_s5] sm:$0xff] }
 0x319   :  { %v709_v59 = vsub.f32 %v701_v21, %v707_v56  ;;  %2784 = vpow2.f32 %v710_v61 }
 0x31a   :  { %v3022_v53 = vpop.eup %2782 }
 0x31b   :  { %v514_v54 = vsel %vm298_vm4, %v3022_v53, 0.0  ;;  %v712_v0 = vmul.f32 1.442695, %v709_v59 }
 0x31c   :  { %515 = vadd.xlane.f32.xlu0 %v514_v54  ;;  %v907_v57 = vpop.xlane.xlu0 %906 }
 0x31d   :  { %v911_v62 = vsub.f32 %v903_v26, %v907_v57  ;;  %2786 = vpow2.f32 %v712_v0 }
 0x31f   :  { %v913_v1 = vmul.f32 1.442695, %v911_v62 }
 0x320   :  { %v910_v63 = vpop.xlane.xlu0 %909 }
 0x321   :  { %v912_v2 = vsub.f32 %v904_v29, %v910_v63  ;;  %2788 = vpow2.f32 %v913_v1 }
 0x323   :  { %v915_v3 = vmul.f32 1.442695, %v912_v2  ;;  %v3034_v4 = vpop.eup %2784  ;;  %v1084_v2 = vld [vmem:[%s3299_s5 + $0x10] sm:$0xff] }
 0x324   :  { %v714_v6 = vsel %vm298_vm4, %v3034_v4, 0.0 }
 0x325   :  { %2790 = vpow2.f32 %v915_v3 }
 0x327   :  { %v3036_v5 = vpop.eup %2786 }
 0x328   :  { %v717_v8 = vsel %vm298_vm4, %v3036_v5, 0.0 }
 0x329   :  { %803 = vrot.lane.b32.xlu1 %v2950_v14, %s2871_s20 }
 0x32b   :  { %v3040_v7 = vpop.eup %2788 }
 0x32c   :  { %v917_v9 = vsel %vm298_vm4, %v3040_v7, 0.0 }
 0x32f   :  { %v3046_v10 = vpop.eup %2790 }
 0x330   :  { %v920_v16 = vsel %vm298_vm4, %v3046_v10, 0.0 }
 0x332   :  { %600 = vrot.lane.b32.xlu0 %v2950_v14, %s2870_s1 }
 0x34d   :  { %715 = vadd.xlane.f32.xlu1 %v714_v6 }
 0x351   :  { %718 = vadd.xlane.f32.xlu0 %v717_v8  ;;  %918 = vadd.xlane.f32.xlu1 %v917_v9 }
 0x355   :  { %921 = vadd.xlane.f32.xlu0 %v920_v16  ;;  %v1415_v16 = vld [vmem:[%s3300_s6 + $0x8] sm:$0xff] }
 0x362   :  { %927 = vrot.lane.b32.xlu1 %v2952_v15, %s2873_s21 }
 0x366   :  { %524 = vrot.lane.b32.xlu1 %v3057_v17, %s2870_s1 }
 0x36a   :  { %930 = vrot.lane.b32.xlu1 %v3057_v17, %s2873_s21 }
 0x36b   :  { %1006 = vrot.lane.b32.xlu0 %v2950_v14, %s2873_s21 }
 0x36f   :  { %727 = vrot.lane.b32.xlu0 %v3057_v17, %s2871_s20 }
 0x38b   :  { %v316_v21 = vpop.xlane.xlu0 %315 }
 0x3a1   :  { %v313_v15 = vpop.xlane.xlu1 %312 }
 0x3a2   :  { %2792 = vrcp.f32 %v313_v15 }
 0x3a3   :  { %2794 = vrcp.f32 %v316_v21 }
 0x3a5   :  { %v513_v22 = vpop.xlane.xlu1 %512 }
 0x3a6   :  { %2796 = vrcp.f32 %v513_v22 }
 0x3a9   :  { %v516_v23 = vpop.xlane.xlu0 %515 }
 0x3aa   :  { %2798 = vrcp.f32 %v516_v23 }
 0x3ac   :  { %v2793_v25 = vpop.eup %2792 }
 0x3ad   :  { %v318_v26 = vmul.f32 %v2793_v25, %v2779_v48  ;;  %v2795_v27 = vpop.eup %2794  ;;  %v601_v32 = vpop.permute.xlu0 %600 }
 0x3ae   :  { %v320_v29 = vmul.f32 %v2795_v27, %v3013_v37 }
 0x3af   :  { %2594 = vmatmul.mubr.msk.f32.vlgmr.msra.gmra.mrb[0].mxu0 %vm298_vm4, %v318_v26 }
 0x3b0   :  { %v2797_v28 = vpop.eup %2796  ;;  %2597 = vmatpush3.msra.mxu0 %v2950_v14  ;;  %2598 = vmatprep.mubr.msk.f32.mxu0 %vm2872_vm12, %v2864_v11  ;;  %v804_v14 = vpop.permute.xlu1 %803 }
 0x3b1   :  { %v518_v30 = vmul.f32 %v2797_v28, %v3018_v50  ;;  %2606 = vmatprep.subr.mxu0 %v2864_v11  ;;  %v1083_v50 = vld [vmem:[%s3299_s5 + $0x8] sm:$0xff]  ;;  %v1416_v28 = vld [vmem:[%s3300_s6 + $0x10] sm:$0xff] }
 0x3b3   :  { %2599 = vmatmul.mubr.msk.f32.vlgmr.msra.gmra.mrb[2].mxu0 %vm298_vm4, %v320_v29  ;;  %2604 = vmatmul.mubr.msk.f32.vlgmr.msra.gmra.mrb[4].mxu1 %vm298_vm4, %v518_v30  ;;  %v1417_v29 = vld [vmem:[%s3300_s6 + $0x18] sm:$0xff] }
 0x3b4   :  { %v2799_v33 = vpop.eup %2798  ;;  %2607 = vmatpush3.msra.mxu0 %v601_v32  ;;  %2612 = vmatpush3.msra.mxu1 %v725_v20  ;;  %v2718_v32 = vpack.c.bf16 %v1417_v29, %v1416_v28 }
 0x3b5   :  { %v520_v34 = vmul.f32 %v2799_v33, %v3022_v53  ;;  %2608 = vmatprep.mubr.msk.f32.mxu0 %vm2872_vm12, %v2864_v11  ;;  %2616 = vmatprep.subr.mxu0 %v2864_v11 }
 0x3b6   :  { %2613 = vmatprep.mubr.msk.f32.mxu1 %vm2872_vm12, %v2864_v11  ;;  %2621 = vmatprep.subr.mxu1 %v2864_v11 }
 0x3b7   :  { %2609 = vmatmul.mubr.msk.f32.vlgmr.msra.gmra.mrb[4].mxu0 %vm298_vm4, %v520_v34 }
 0x3b8   :  { %2617 = vmatpush3.msra.mxu0 %v804_v14  ;;  %2618 = vmatprep.mubr.msk.f32.mxu0 %vm2872_vm12, %v2864_v11 }
 0x3b9   :  { %2626 = vmatprep.subr.mxu0 %v2864_v11 }
 0x3da   :  { %v716_v36 = vpop.xlane.xlu1 %715 }
 0x3db   :  { %2800 = vrcp.f32 %v716_v36 }
 0x3de   :  { %v919_v37 = vpop.xlane.xlu1 %918  ;;  %v719_v39 = vpop.xlane.xlu0 %718 }
 0x3df   :  { %2802 = vrcp.f32 %v919_v37 }
 0x3e0   :  { %2804 = vrcp.f32 %v719_v39 }
 0x3e2   :  { %v922_v40 = vpop.xlane.xlu0 %921  ;;  %v928_v43 = vpop.permute.xlu1 %927 }
 0x3e3   :  { %2806 = vrcp.f32 %v922_v40 }
 0x3e5   :  { %v2801_v41 = vpop.eup %2800 }
 0x3e6   :  { %v721_v42 = vmul.f32 %v2801_v41, %v3034_v4  ;;  %v1007_v48 = vpop.permute.xlu0 %1006  ;;  %v525_v55 = vpop.permute.xlu1 %524  ;;  %v1085_v4 = vld [vmem:[%s3299_s5 + $0x18] sm:$0xff] }
 0x3e8   :  { %2614 = vmatmul.mubr.msk.f32.vlgmr.msra.gmra.mrb[6].mxu1 %vm298_vm4, %v721_v42 }
 0x3e9   :  { %v2803_v44 = vpop.eup %2802  ;;  %2622 = vmatpush3.msra.mxu1 %v928_v43  ;;  %2623 = vmatprep.mubr.msk.f32.mxu1 %vm2872_vm12, %v2864_v11 }
 0x3ea   :  { %v2805_v45 = vpop.eup %2804  ;;  %v924_v35 = vmul.f32 %v2803_v44, %v3040_v7  ;;  %2631 = vmatprep.subr.mxu1 %v1083_v50  ;;  %v931_v9 = vpop.permute.xlu1 %930 }
 0x3eb   :  { %v723_v46 = vmul.f32 %v2805_v45, %v3036_v5  ;;  %v728_v5 = vpop.permute.xlu0 %727 }
 0x3ec   :  { %2624 = vmatmul.mubr.msk.f32.vlgmr.msra.gmra.mrb[8].mxu1 %vm298_vm4, %v924_v35 }
 0x3ed   :  { %v2807_v47 = vpop.eup %2806  ;;  %2619 = vmatmul.mubr.msk.f32.vlgmr.msra.gmra.mrb[6].mxu0 %vm298_vm4, %v723_v46  ;;  %2632 = vmatpush3.msra.mxu1 %v1083_v50 }
 0x3ee   :  { %v926_v49 = vmul.f32 %v2807_v47, %v3046_v10  ;;  %2627 = vmatpush3.msra.mxu0 %v1007_v48  ;;  %2628 = vmatprep.mubr.msk.f32.mxu0 %vm2872_vm12, %v2864_v11  ;;  %v1414_v10 = vld [vmem:[%s3300_s6] sm:$0xff] }
 0x3ef   :  { %2662 = vmatprep.subr.mxu0 %v2864_v11  ;;  %2636 = vmatprep.subr.mxu1 %v1082_v51  ;;  %v2714_v25 = vpack.c.bf16 %v1415_v16, %v1414_v10 }
 0x3f1   :  { %2629 = vmatmul.mubr.msk.f32.vlgmr.msra.gmra.mrb[8].mxu0 %vm298_vm4, %v926_v49 }
 0x3f2   :  { %2664 = vmatprep.mubr.msk.f32.mxu0 %vm2872_vm12, %v2864_v11 }
 0x482   :  { %v396_v53 = vpop.f32.mrb[0].mxu0 }
 0x483   :  { %v2595_v54 = vpop.f32.mrb[1].mxu0  ;;  %v397_v1 = vadd.f32 %v3057_v17, %v396_v53 }
 0x486   :  { %v596_v56 = vpop.f32.mrb[4].mxu1  ;;  %v469_v57 = vpop.f32.mrb[2].mxu0 }
 0x487   :  { %v597_v58 = vadd.f32 %v596_v56, %v525_v55  ;;  %v2600_v59 = vpop.f32.mrb[3].mxu0  ;;  %v2605_v61 = vpop.f32.mrb[5].mxu1  ;;  %v470_v3 = vadd.f32 %v3057_v17, %v469_v57 }
 0x489   :  { %2633 = vmatprep.mubr.msk.f32.mxu1 %vm298_vm4, %v597_v58 }
 0x48a   :  { %v672_v62 = vpop.f32.mrb[4].mxu0 }
 0x48b   :  { %v673_v63 = vadd.f32 %v672_v62, %v525_v55  ;;  %v2610_v0 = vpop.f32.mrb[5].mxu0 }
 0x48d   :  { %2634 = vmatmul.mubr.msk.f32.vlgmr.msra.gmra.mrb[10].mxu1 %vm298_vm4, %v673_v63 }
 0x48e   :  { %2638 = vmatprep.mubr.msk.f32.mxu1 %vm298_vm4, %v397_v1  ;;  %2637 = vmatpush3.msra.mxu1 %v1082_v51 }
 0x48f   :  { %2641 = vmatprep.subr.mxu1 %v1084_v2 }
 0x495   :  { %2639 = vmatmul.mubr.msk.f32.vlgmr.msra.gmra.mrb[10].mxu1 %vm298_vm4, %v470_v3 }
 0x496   :  { %2642 = vmatpush3.msra.mxu1 %v1084_v2 }
 0x497   :  { %2646 = vmatprep.subr.mxu1 %v1085_v4 }
 0x4bb   :  { %v799_v6 = vpop.f32.mrb[6].mxu1 }
 0x4bc   :  { %v800_v7 = vadd.f32 %v799_v6, %v728_v5  ;;  %v2615_v8 = vpop.f32.mrb[7].mxu1 }
 0x4be   :  { %2643 = vmatprep.mubr.msk.f32.mxu1 %vm298_vm4, %v800_v7 }
 0x4bf   :  { %v1002_v17 = vpop.f32.mrb[8].mxu1 }
 0x4c0   :  { %v1003_v20 = vadd.f32 %v1002_v17, %v931_v9  ;;  %v875_v21 = vpop.f32.mrb[6].mxu0  ;;  %v2625_v15 = vpop.f32.mrb[9].mxu1 }
 0x4c1   :  { %v876_v22 = vadd.f32 %v875_v21, %v728_v5  ;;  %v2620_v23 = vpop.f32.mrb[7].mxu0 }
 0x4c3   :  { %2644 = vmatmul.mubr.msk.f32.vlgmr.msra.gmra.mrb[10].mxu1 %vm298_vm4, %v876_v22 }
 0x4c4   :  { %2647 = vmatpush3.msra.mxu1 %v1085_v4  ;;  %v1078_v26 = vpop.f32.mrb[8].mxu0  ;;  %2648 = vmatprep.mubr.msk.f32.mxu1 %vm298_vm4, %v1003_v20 }
 0x4c5   :  { %v2630_v27 = vpop.f32.mrb[9].mxu0  ;;  %2715 = vmatprep.subr.bf16.mxu1 %v2714_v25  ;;  %v1079_v30 = vadd.f32 %v1078_v26, %v931_v9 }
 0x4cb   :  { %2649 = vmatmul.mubr.msk.f32.vlgmr.msra.gmra.mrb[10].mxu1 %vm298_vm4, %v1079_v30 }
 0x4cc   :  { %2717 = vmatpush3.bf16.msra.mxu1 %v2714_v25 }
 0x4cd   :  { %2719 = vmatprep.subr.bf16.mxu1 %v2718_v32 }
 0x4d0   :  { %2721 = vmatpush3.bf16.msra.mxu1 %v2718_v32 }
 0x59e   :  { %v3134_v33 = vpop.f32.mrb[10].mxu1 }
 0x59f   :  { %v3136_v34 = vpop.f32.mrb[11].mxu1 }
 0x5a0   :  { %2659 = vmatprep.mubr.msk.f32.mxu1 %vm124_vm1, %v3136_v34  ;;  %2663 = vmatpush3.msra.mxu0 %v3136_v34 }
 0x5a1   :  { %2660 = vmatmul.mubr.msk.f32.vlgmr.msra.gmra.mrb[12].mxu1 %vm124_vm1, %v3134_v33  ;;  %2667 = vmatprep.subr.mxu0 %v2864_v11 }
 0x674   :  { %v2661_v14 = vpop.f32.mrb[12].mxu1 }
 0x675   :  { %1771 = vperm.xlu0 %2769, %v2661_v14   ;;  %1571 = vperm.xlu1 %2768, %v2661_v14   ;;  %v1491_v36 = vpop.f32.mrb[13].mxu1 }
 0x679   :  { %2771 = vset.pattern.permute.xlu0 %v2868_v19  ;;  %2770 = vset.pattern.permute.xlu1 %v2867_v18 }
 0x67a   :  { %2177 = vperm.xlu0 %2771, %v2661_v14   ;;  %1974 = vperm.xlu1 %2770, %v2661_v14  }
 0x67e   :  { %2772 = vset.pattern.permute.xlu0 %v2866_v13  ;;  %2773 = vset.pattern.permute.xlu1 %v2865_v12 }
 0x67f   :  { %1767 = vperm.xlu1 %2773, %v1491_v36   ;;  %1566 = vperm.xlu0 %2772, %v1491_v36  }
 0x683   :  { %2774 = vset.pattern.permute.xlu1 %v2867_v18  ;;  %2775 = vset.pattern.permute.xlu0 %v2868_v19 }
 0x684   :  { %1970 = vperm.xlu1 %2774, %v1491_v36   ;;  %2173 = vperm.xlu0 %2775, %v1491_v36  }
 0x6a2   :  { %1532 = vxpose.xlu0.b32.start.end [1/1] (short) (narrow) %v2661_v14, 8 }
 0x6ad   :  { %1500 = vxpose.xlu1.b32.start.end [1/1] (short) (narrow) %v1491_v36, 8 }
 0x6f4   :  { %v1772_v37 = vpop.permute.xlu0 %1771  ;;  %v1572_v40 = vpop.permute.xlu1 %1571 }
 0x6f9   :  { %v2178_v39 = vpop.permute.xlu0 %2177  ;;  %v1975_v42 = vpop.permute.xlu1 %1974 }
 0x6fe   :  { %v1567_v41 = vpop.permute.xlu0 %1566  ;;  %v1768_v13 = vpop.permute.xlu1 %1767 }
 0x703   :  { %v2174_v43 = vpop.permute.xlu0 %2173  ;;  %v1971_v19 = vpop.permute.xlu1 %1970 }
 0x722   :  { %v1548_v44 = vpop.trf.xlu0 }
 0x723   :  { %v1581_v12 = vrot.slane %v1548_v44, %v2967_v24  ;;  %v1781_v18 = vrot.slane %v1548_v44, %v2980_v38  ;;  %v1984_v49 = vrot.slane %v1548_v44, %v2987_v52  ;;  %v2187_v55 = vrot.slane %v1548_v44, %v2997_v60 }
 0x725   :  { %v1583_v45 = vadd.f32 %v1581_v12, %v1572_v40  ;;  %v1783_v48 = vadd.f32 %v1781_v18, %v1772_v37  ;;  %v1986_v54 = vadd.f32 %v1984_v49, %v1975_v42  ;;  %v2189_v59 = vadd.f32 %v2187_v55, %v2178_v39 }
 0x727   :  { %vm1585_vm13 = vcmp.gt.f32.partialorder %v1583_v45, 0.0  ;;  %v1587_v35 = vmul.f32 0.2, %v1583_v45  ;;  %v1787_v57 = vmul.f32 0.2, %v1783_v48  ;;  %vm1785_vm14 = vcmp.gt.f32.partialorder %v1783_v48, 0.0 }
 0x728   :  { %v1990_v63 = vmul.f32 0.2, %v1986_v54  ;;  %vm1988_vm0 = vcmp.gt.f32.partialorder %v1986_v54, 0.0  ;;  %v2193_v3 = vmul.f32 0.2, %v2189_v59  ;;  %vm2191_vm1 = vcmp.gt.f32.partialorder %v2189_v59, 0.0 }
 0x729   :  { %v1589_v46 = vsel %vm1585_vm13, %v1583_v45, %v1587_v35  ;;  %v1789_v62 = vsel %vm1785_vm14, %v1783_v48, %v1787_v57 }
 0x72a   :  { %v3153_v47 = vadd.f32 %v1589_v46, %v2973_v31  ;;  %v1791_v2 = vadd.f32 %v1789_v62, %v2973_v31  ;;  %v2195_v6 = vsel %vm2191_vm1, %v2189_v59, %v2193_v3 }
 0x72b   :  { %v3172_v8 = vadd.f32 %v2195_v6, %v2973_v31 }
 0x72c   :  { %v1595_v50 = vsel %vm298_vm4, %v3153_v47, -inf  ;;  %v1795_v4 = vsel %vm298_vm4, %v1791_v2, -inf }
 0x72d   :  { %v1516_v51 = vpop.trf.xlu1  ;;  %1596 = vmax.xlane.f32.xlu1 %v1595_v50  ;;  %v2201_v9 = vsel %vm298_vm4, %v3172_v8, -inf }
 0x72e   :  { %v1577_v53 = vrot.slane %v1516_v51, %v2967_v24  ;;  %v1992_v24 = vsel %vm1988_vm0, %v1986_v54, %v1990_v63  ;;  %v1777_v10 = vrot.slane %v1516_v51, %v2980_v38  ;;  %v1980_v17 = vrot.slane %v1516_v51, %v2987_v52 }
 0x72f   :  { %v3165_v5 = vadd.f32 %v1992_v24, %v2973_v31  ;;  %v2183_v21 = vrot.slane %v1516_v51, %v2997_v60 }
 0x730   :  { %v1582_v56 = vadd.f32 %v1577_v53, %v1567_v41  ;;  %v1782_v16 = vadd.f32 %v1777_v10, %v1768_v13  ;;  %v1985_v20 = vadd.f32 %v1980_v17, %v1971_v19 }
 0x731   :  { %v1998_v7 = vsel %vm298_vm4, %v3165_v5, -inf  ;;  %v2188_v22 = vadd.f32 %v2183_v21, %v2174_v43 }
 0x732   :  { %vm1584_vm15 = vcmp.gt.f32.partialorder %v1582_v56, 0.0  ;;  %v1586_v58 = vmul.f32 0.2, %v1582_v56  ;;  %v1786_v15 = vmul.f32 0.2, %v1782_v16  ;;  %vm1784_vm2 = vcmp.gt.f32.partialorder %v1782_v16, 0.0 }
 0x733   :  { %v1989_v25 = vmul.f32 0.2, %v1985_v20  ;;  %vm1987_vm3 = vcmp.gt.f32.partialorder %v1985_v20, 0.0  ;;  %v2192_v28 = vmul.f32 0.2, %v2188_v22  ;;  %vm2190_vm5 = vcmp.gt.f32.partialorder %v2188_v22, 0.0 }
 0x734   :  { %v1588_v61 = vsel %vm1584_vm15, %v1582_v56, %v1586_v58  ;;  %v1788_v23 = vsel %vm1784_vm2, %v1782_v16, %v1786_v15 }
 0x735   :  { %v1590_v0 = vadd.f32 %v1588_v61, %v2973_v31  ;;  %v1790_v26 = vadd.f32 %v1788_v23, %v2973_v31  ;;  %v1991_v27 = vsel %vm1987_vm3, %v1985_v20, %v1989_v25  ;;  %v2194_v52 = vsel %vm2190_vm5, %v2188_v22, %v2192_v28 }
 0x736   :  { %v1993_v38 = vadd.f32 %v1991_v27, %v2973_v31  ;;  %v2196_v60 = vadd.f32 %v2194_v52, %v2973_v31 }
 0x737   :  { %v1592_v1 = vsel %vm298_vm4, %v1590_v0, -inf  ;;  %v1792_v29 = vsel %vm298_vm4, %v1790_v26, -inf }
 0x738   :  { %1593 = vmax.xlane.f32.xlu0 %v1592_v1  ;;  %v1995_v30 = vsel %vm298_vm4, %v1993_v38, -inf  ;;  %v2198_v32 = vsel %vm298_vm4, %v2196_v60, -inf }
 0x73c   :  { %1796 = vmax.xlane.f32.xlu0 %v1795_v4 }
 0x73e   :  { %1814 = vrot.lane.b32.xlu1 %v3136_v34, %s2870_s1 }
 0x740   :  { %1999 = vmax.xlane.f32.xlu0 %v1998_v7 }
 0x744   :  { %2202 = vmax.xlane.f32.xlu0 %v2201_v9 }
 0x762   :  { %1793 = vmax.xlane.f32.xlu1 %v1792_v29 }
 0x766   :  { %1996 = vmax.xlane.f32.xlu1 %v1995_v30 }
 0x76a   :  { %2199 = vmax.xlane.f32.xlu1 %v2198_v32 }
 0x77b   :  { %2017 = vrot.lane.b32.xlu1 %v3136_v34, %s2871_s20 }
 0x7ba   :  { %v1597_v14 = vpop.xlane.xlu1 %1596 }
 0x7bb   :  { %v1599_v36 = vsub.f32 %v3153_v47, %v1597_v14 }
 0x7bd   :  { %v1602_v37 = vmul.f32 1.442695, %v1599_v36 }
 0x7be   :  { %v1815_v19 = vpop.permute.xlu1 %1814 }
 0x7bf   :  { %2808 = vpow2.f32 %v1602_v37 }
 0x7c5   :  { %v1594_v39 = vpop.xlane.xlu0 %1593 }
 0x7c6   :  { %v1598_v40 = vsub.f32 %v1590_v0, %v1594_v39 }
 0x7c8   :  { %v1600_v41 = vmul.f32 1.442695, %v1598_v40 }
 0x7c9   :  { %v3188_v42 = vpop.eup %2808  ;;  %v1797_v43 = vpop.xlane.xlu0 %1796 }
 0x7ca   :  { %2810 = vpow2.f32 %v1600_v41  ;;  %v1799_v31 = vsub.f32 %v1791_v2, %v1797_v43  ;;  %v1607_v44 = vsel %vm298_vm4, %v3188_v42, 0.0 }
 0x7cb   :  { %1608 = vadd.xlane.f32.xlu0 %v1607_v44 }
 0x7cc   :  { %v1802_v13 = vmul.f32 1.442695, %v1799_v31 }
 0x7cd   :  { %v2000_v47 = vpop.xlane.xlu0 %1999 }
 0x7ce   :  { %2812 = vpow2.f32 %v1802_v13  ;;  %v2002_v50 = vsub.f32 %v3165_v5, %v2000_v47 }
 0x7d0   :  { %v2005_v56 = vmul.f32 1.442695, %v2002_v50 }
 0x7d1   :  { %v2203_v51 = vpop.xlane.xlu0 %2202 }
 0x7d2   :  { %v2205_v57 = vsub.f32 %v3172_v8, %v2203_v51  ;;  %v3224_v8 = vld [vmem:[%s3301_s7] ss:$0 sm:$0xff]  ;;  %s2874_s7 = smov [#allocation2]  }
 0x7d3   :  { %s2470_s2 = sshll.u32 %s2874_s7, 4  ;;  %s2471_s2 = int_to_ptr.vmem [resolvable:$true] %s2470_s2 }
 0x7d4   :  { %v2811_v12 = vpop.eup %2810  ;;  %v2208_v61 = vmul.f32 1.442695, %v2205_v57  ;;  %s2840_s17 = scalar_lea.vmem %s2471_s2, 160  ;;  %p2845_p1 = scmp.lt.s32.totalorder %s2471_s2, %s2471_s2 }
 0x7d5   :  { %v1604_v45 = vsel %vm298_vm4, %v2811_v12, 0.0  ;;  %p2841_p0 = scmp.ne.s32.totalorder %s2471_s2, %s2840_s17  ;;  %p2846_p2 = scmp.lt.s32.totalorder %s2840_s17, %s2840_s17 }
 0x7d6   :  { %1605 = vadd.xlane.f32.xlu1 %v1604_v45 }
 0x7d7   :  { %p2847_p3 = por %p2846_p2, %p2845_p1 }
 0x7d8   :  { %v3193_v35 = vpop.eup %2812 }
 0x7d9   :  { %v1807_v18 = vsel %vm298_vm4, %v3193_v35, 0.0  ;;  %p2848_p4 = pnand %p2847_p3, %p2841_p0 }
 0x7da   :  { %1808 = vadd.xlane.f32.xlu0 %v1807_v18 }
 0x7e7   :  { %2096 = vrot.lane.b32.xlu1 %v3134_v33, %s2871_s20 }
 0x7ef   :  { %v1794_v46 = vpop.xlane.xlu1 %1793 }
 0x7f0   :  { %1893 = vrot.lane.b32.xlu0 %v3134_v33, %s2870_s1  ;;  %v1798_v49 = vsub.f32 %v1790_v26, %v1794_v46 }
 0x7f2   :  { %v1800_v53 = vmul.f32 1.442695, %v1798_v49 }
 0x7f3   :  { %v1997_v48 = vpop.xlane.xlu1 %1996 }
 0x7f4   :  { %v2001_v54 = vsub.f32 %v1993_v38, %v1997_v48  ;;  %2814 = vpow2.f32 %v1800_v53 }
 0x7f5   :  { %2816 = vpow2.f32 %v2005_v56 }
 0x7f6   :  { %v2003_v58 = vmul.f32 1.442695, %v2001_v54 }
 0x7f7   :  { %v2200_v55 = vpop.xlane.xlu1 %2199 }
 0x7f8   :  { %v2204_v59 = vsub.f32 %v2196_v60, %v2200_v55  ;;  %2818 = vpow2.f32 %v2003_v58 }
 0x7f9   :  { %2820 = vpow2.f32 %v2208_v61 }
 0x7fa   :  { %v2206_v62 = vmul.f32 1.442695, %v2204_v59 }
 0x7fb   :  { %v2018_v9 = vpop.permute.xlu1 %2017 }
 0x7fc   :  { %2822 = vpow2.f32 %v2206_v62 }
 0x7fe   :  { %v2815_v63 = vpop.eup %2814 }
 0x7ff   :  { %v3203_v0 = vpop.eup %2816  ;;  %v1804_v1 = vsel %vm298_vm4, %v2815_v63, 0.0 }
 0x800   :  { %v2010_v4 = vsel %vm298_vm4, %v3203_v0, 0.0 }
 0x802   :  { %v2819_v2 = vpop.eup %2818 }
 0x803   :  { %v3206_v24 = vpop.eup %2820  ;;  %v2007_v3 = vsel %vm298_vm4, %v2819_v2, 0.0 }
 0x804   :  { %v2213_v7 = vsel %vm298_vm4, %v3206_v24, 0.0 }
 0x806   :  { %v3211_v5 = vpop.eup %2822 }
 0x807   :  { %v2210_v6 = vsel %vm298_vm4, %v3211_v5, 0.0 }
 0x80b   :  { %1805 = vadd.xlane.f32.xlu1 %v1804_v1 }
 0x80f   :  { %2008 = vadd.xlane.f32.xlu1 %v2007_v3  ;;  %2011 = vadd.xlane.f32.xlu0 %v2010_v4 }
 0x813   :  { %2211 = vadd.xlane.f32.xlu1 %v2210_v6  ;;  %2214 = vadd.xlane.f32.xlu0 %v2213_v7 }
 0x824   :  { %2220 = vrot.lane.b32.xlu1 %v3136_v34, %s2873_s21 }
 0x828   :  { %1817 = vrot.lane.b32.xlu1 %v3224_v8, %s2870_s1 }
 0x829   :  { %2299 = vrot.lane.b32.xlu0 %v3134_v33, %s2873_s21 }
 0x82c   :  { %2223 = vrot.lane.b32.xlu1 %v3224_v8, %s2873_s21 }
 0x82d   :  { %2020 = vrot.lane.b32.xlu0 %v3224_v8, %s2871_s20 }
 0x858   :  { %v1609_v10 = vpop.xlane.xlu0 %1608 }
 0x863   :  { %v1606_v34 = vpop.xlane.xlu1 %1605 }
 0x864   :  { %2824 = vrcp.f32 %v1606_v34 }
 0x865   :  { %2826 = vrcp.f32 %v1609_v10 }
 0x867   :  { %v2097_v15 = vpop.permute.xlu1 %2096  ;;  %v1809_v22 = vpop.xlane.xlu0 %1808 }
 0x86e   :  { %v2825_v16 = vpop.eup %2824 }
 0x86f   :  { %v1611_v17 = vmul.f32 %v2825_v16, %v2811_v12  ;;  %v2827_v20 = vpop.eup %2826 }
 0x870   :  { %v1613_v21 = vmul.f32 %v2827_v20, %v3188_v42 }
 0x871   :  { %2665 = vmatmul.mubr.msk.f32.vlgmr.msra.gmra.mrb[10].mxu0 %vm298_vm4, %v1611_v17 }
 0x872   :  { %2668 = vmatpush3.msra.mxu0 %v3134_v33  ;;  %2669 = vmatprep.mubr.msk.f32.mxu0 %vm2872_vm12, %v2864_v11  ;;  %v1894_v33 = vpop.permute.xlu0 %1893 }
 0x873   :  { %2672 = vmatprep.subr.mxu0 %v2864_v11 }
 0x875   :  { %2670 = vmatmul.mubr.msk.f32.vlgmr.msra.gmra.mrb[12].mxu0 %vm298_vm4, %v1613_v21 }
 0x876   :  { %2673 = vmatpush3.msra.mxu0 %v1815_v19  ;;  %2674 = vmatprep.mubr.msk.f32.mxu0 %vm2872_vm12, %v2864_v11 }
 0x877   :  { %2677 = vmatprep.subr.mxu0 %v2864_v11 }
 0x898   :  { %v1806_v23 = vpop.xlane.xlu1 %1805 }
 0x899   :  { %2828 = vrcp.f32 %v1806_v23 }
 0x89a   :  { %2830 = vrcp.f32 %v1809_v22 }
 0x89c   :  { %v2009_v25 = vpop.xlane.xlu1 %2008  ;;  %v2012_v26 = vpop.xlane.xlu0 %2011 }
 0x89d   :  { %2832 = vrcp.f32 %v2009_v25 }
 0x89e   :  { %2834 = vrcp.f32 %v2012_v26 }
 0x8a0   :  { %v2212_v29 = vpop.xlane.xlu1 %2211  ;;  %v2215_v30 = vpop.xlane.xlu0 %2214 }
 0x8a1   :  { %2836 = vrcp.f32 %v2212_v29 }
 0x8a2   :  { %2838 = vrcp.f32 %v2215_v30 }
 0x8a3   :  { %v2829_v27 = vpop.eup %2828 }
 0x8a4   :  { %v1811_v28 = vmul.f32 %v2829_v27, %v2815_v63  ;;  %v2831_v38 = vpop.eup %2830  ;;  %v2221_v39 = vpop.permute.xlu1 %2220 }
 0x8a5   :  { %v1813_v52 = vmul.f32 %v2831_v38, %v3193_v35  ;;  %v2300_v42 = vpop.permute.xlu0 %2299 }
 0x8a6   :  { %2675 = vmatmul.mubr.msk.f32.vlgmr.msra.gmra.mrb[10].mxu0 %vm298_vm4, %v1811_v28 }
 0x8a7   :  { %2678 = vmatpush3.msra.mxu0 %v1894_v33  ;;  %2679 = vmatprep.mubr.msk.f32.mxu0 %vm2872_vm12, %v2864_v11  ;;  %v2833_v60 = vpop.eup %2832 }
 0x8a8   :  { %2682 = vmatprep.subr.mxu0 %v2864_v11  ;;  %v2014_v32 = vmul.f32 %v2833_v60, %v2819_v2  ;;  %v2835_v14 = vpop.eup %2834  ;;  %v1818_v31 = vpop.permute.xlu1 %1817 }
 0x8a9   :  { %v2016_v36 = vmul.f32 %v2835_v14, %v3203_v0  ;;  %v2722_v44 = vadd.f32 %v3224_v8, %v1818_v31  ;;  %v2021_v13 = vpop.permute.xlu0 %2020 }
 0x8aa   :  { %2680 = vmatmul.mubr.msk.f32.vlgmr.msra.gmra.mrb[12].mxu0 %vm298_vm4, %v1813_v52 }
 0x8ab   :  { %2683 = vmatpush3.msra.mxu0 %v2018_v9  ;;  %2684 = vmatprep.mubr.msk.f32.mxu0 %vm2872_vm12, %v2864_v11  ;;  %v2837_v37 = vpop.eup %2836  ;;  %v2723_v12 = vadd.f32 %v2722_v44, %v2021_v13 }
 0x8ac   :  { %2687 = vmatprep.subr.mxu0 %v2864_v11  ;;  %v2217_v40 = vmul.f32 %v2837_v37, %v3211_v5  ;;  %v2839_v41 = vpop.eup %2838  ;;  %v2224_v45 = vpop.permute.xlu1 %2223 }
 0x8ad   :  { %v2219_v43 = vmul.f32 %v2839_v41, %v3206_v24  ;;  %v2724_v35 = vadd.f32 %v2723_v12, %v2224_v45 }
 0x8ae   :  { %2685 = vmatmul.mubr.msk.f32.vlgmr.msra.gmra.mrb[10].mxu0 %vm298_vm4, %v2014_v32 }
 0x8af   :  { %2688 = vmatpush3.msra.mxu0 %v2097_v15  ;;  %2689 = vmatprep.mubr.msk.f32.mxu0 %vm2872_vm12, %v2864_v11 }
 0x8b0   :  { %2692 = vmatprep.subr.mxu0 %v2864_v11 }
 0x8b2   :  { %2690 = vmatmul.mubr.msk.f32.vlgmr.msra.gmra.mrb[12].mxu0 %vm298_vm4, %v2016_v36 }
 0x8b3   :  { %2693 = vmatpush3.msra.mxu0 %v2221_v39  ;;  %2694 = vmatprep.mubr.msk.f32.mxu0 %vm2872_vm12, %v2864_v11 }
 0x8b4   :  { %2697 = vmatprep.subr.mxu0 %v2864_v11 }
 0x8b6   :  { %2695 = vmatmul.mubr.msk.f32.vlgmr.msra.gmra.mrb[10].mxu0 %vm298_vm4, %v2217_v40 }
 0x8b7   :  { %2698 = vmatpush3.msra.mxu0 %v2300_v42  ;;  %2699 = vmatprep.mubr.msk.f32.mxu0 %vm2872_vm12, %v2864_v11 }
 0x8ba   :  { %2700 = vmatmul.mubr.msk.f32.vlgmr.msra.gmra.mrb[12].mxu0 %vm298_vm4, %v2219_v43  ;;  %vm2386_vm4 = vcmask 1041409  }
 0x989   :  { %v2295_v18 = vpop.f32.mrb[10].mxu0 }
 0x98a   :  { %v2725_v19 = vadd.f32 %v2724_v35, %v2295_v18  ;;  %v2696_v46 = vpop.f32.mrb[11].mxu0 }
 0x98c   :  { %v2381_v47 = vmul.f32 0.25, %v2725_v19 }
 0x98d   :  { %v2371_v48 = vpop.f32.mrb[12].mxu0 }
 0x98e   :  { %v2438_v49 = vrot.slane %v2381_v47, 2  ;;  %v2729_v11 = vadd.f32 %v2724_v35, %v2371_v48  ;;  %v2398_v50 = vsel %vm2397_vm6, %v2381_v47, -inf  ;;  %v2418_v51 = vsel %vm2397_vm6, %v2381_v47, inf  ;;  %v2701_v53 = vpop.f32.mrb[13].mxu0 }
 0x98f   :  { %v2399_v54 = vrot.slane %v2398_v50, 4  ;;  %v2419_v55 = vrot.slane %v2418_v51, 4 }
 0x990   :  { %v2382_v56 = vmul.f32 0.25, %v2729_v11  ;;  %v2443_v57 = vsel %vm2442_vm7, %v2438_v49, 0.0 }
 0x991   :  { %v2400_v58 = vmax.f32 %v2398_v50, %v2399_v54  ;;  %v2420_v59 = vmin.f32 %v2418_v51, %v2419_v55  ;;  %v2444_v61 = vrot.slane %v2443_v57, 4 }
 0x992   :  { %v2385_v62 = vrot.slane %v2382_v56, 7  ;;  %v2405_v63 = vsel %vm2397_vm6, %v2382_v56, -inf  ;;  %v2425_v0 = vsel %vm2397_vm6, %v2382_v56, inf  ;;  %v2439_v1 = vrot.slane %v2382_v56, 2 }
 0x993   :  { %v2401_v2 = vrot.slane %v2400_v58, 2  ;;  %v2406_v24 = vrot.slane %v2405_v63, 4  ;;  %v2421_v3 = vrot.slane %v2420_v59, 2  ;;  %v2426_v4 = vrot.slane %v2425_v0, 4 }
 0x994   :  { %v2387_v5 = vsel %vm2386_vm4, %v2385_v62, %v2381_v47  ;;  %v2392_v6 = vsel %vm2391_vm9, %v2385_v62, %v2381_v47  ;;  %v2445_v7 = vadd.f32 %v2444_v61, %v2443_v57  ;;  %v2450_v8 = vsel %vm2442_vm7, %v2439_v1, 0.0 }
 0x995   :  { %2390 = vst.msk [vmem:[#allocation2] sm:$0x3] %vm2389_vm8, %v2387_v5  ;;  %v2402_v9 = vmax.f32 %v2400_v58, %v2401_v2  ;;  %v2407_v10 = vmax.f32 %v2405_v63, %v2406_v24  ;;  %v2422_v34 = vmin.f32 %v2420_v59, %v2421_v3  ;;  %v2427_v16 = vmin.f32 %v2425_v0, %v2426_v4 }
 0x996   :  { %2396 = vst.msk [vmem:[#allocation2 + $0x1] sm:$0x6] %vm2395_vm10, %v2392_v6  ;;  %v2446_v17 = vrot.slane %v2445_v7, 2  ;;  %v2451_v20 = vrot.slane %v2450_v8, 4 }
 0x997   :  { %v2408_v21 = vrot.slane %v2407_v10, 2  ;;  %v2428_v15 = vrot.slane %v2427_v16, 2  ;;  %v2403_v33 = vrot.slane %v2402_v9, 1  ;;  %v2423_v26 = vrot.slane %v2422_v34, 1 }
 0x998   :  { %v2447_v22 = vadd.f32 %v2446_v17, %v2445_v7  ;;  %v2452_v23 = vadd.f32 %v2451_v20, %v2450_v8 }
 0x999   :  { %v2409_v25 = vmax.f32 %v2407_v10, %v2408_v21  ;;  %v2429_v27 = vmin.f32 %v2427_v16, %v2428_v15  ;;  %v2404_v60 = vmax.f32 %v2402_v9, %v2403_v33  ;;  %v2424_v14 = vmin.f32 %v2422_v34, %v2423_v26 }
 0x99a   :  { %v2448_v28 = vrot.slane %v2447_v22, 1  ;;  %v2453_v29 = vrot.slane %v2452_v23, 2 }
 0x99b   :  { %v2410_v38 = vrot.slane %v2409_v25, 1  ;;  %v2430_v52 = vrot.slane %v2429_v27, 1 }
 0x99c   :  { %v2454_v30 = vadd.f32 %v2453_v29, %v2452_v23  ;;  %v2449_v37 = vadd.f32 %v2448_v28, %v2447_v22 }
 0x99d   :  { %v2411_v32 = vmax.f32 %v2409_v25, %v2410_v38  ;;  %v2431_v36 = vmin.f32 %v2429_v27, %v2430_v52 }
 0x99e   :  { %v2455_v39 = vrot.slane %v2454_v30, 1  ;;  %v2457_v43 = vmul.f32 0.16666667, %v2449_v37 }
 0x99f   :  { %v2414_v40 = vsel %vm2386_vm4, %v2411_v32, %v2404_v60  ;;  %v2434_v41 = vsel %vm2386_vm4, %v2431_v36, %v2424_v14 }
 0x9a0   :  { %2417 = vst.msk [vmem:[#allocation2 + $0x4] sm:$0x3] %vm2389_vm8, %v2414_v40  ;;  %2437 = vst.msk [vmem:[#allocation2 + $0x6] sm:$0x3] %vm2389_vm8, %v2434_v41  ;;  %v2456_v42 = vadd.f32 %v2455_v39, %v2454_v30 }
 0x9a2   :  { %v2458_v31 = vmul.f32 0.16666667, %v2456_v42 }
 0x9a4   :  { %v2461_v44 = vsel %vm2386_vm4, %v2458_v31, %v2457_v43 }
 0x9a5   :  { %2464 = vst.msk [vmem:[#allocation2 + $0x8] sm:$0x3] %vm2389_vm8, %v2461_v44 }
 0x9a6   :  { %2851 = shalt.err (!%p2848_p4)
}
 0x9a7   :  { %s2852_s0 = scalar_lea.hbm %s3302_s8, 160 }
 0x9a8   :  { %p2853_p5 = scmp.ne.s32.totalorder %s3302_s8, %s2852_s0  ;;  %p2856_p6 = scmp.lt.u32.totalorder %s2852_s0, %s3302_s8 }
 0x9aa   :  { %p2858_p7 = pnand %p2856_p6, %p2853_p5 }
 0x9ac   :  { %2861 = shalt.err (!%p2858_p7)
}
 0x9ad   :  { %s2875_s22 = smov 32   ;;  %s2876_s23 = smov 2  }
 0x9ae   :  { %2476 = dma.vmem_to_hbm [thread:$0]  %s2471_s2, 160, %s3302_s8, [#allocation3], %s2875_s22, %s2875_s22, %s2876_s23  }
 0x9af   :  { %2862 = dma.done.wait [#allocation3], 160  }
 0x9b0   :  { %2863 = vsyncadd [#allocation3], 4294967136 }
 0x9b1   :  { %2480 = vsyncpa [#allocation3], 1 }

</bundles_post_ra>
